<compile_context>
chip_gen: v5e
topology: v5e:2x2
jax: 0.10.0
libtpu: 0.0.40
codegen_flags: <defaults>
</compile_context>

<pallas_src>
import functools

import jax
import jax.numpy as jnp
from jax.experimental import pallas as pl
from jax.experimental.pallas import tpu as pltpu

_EPS = 1e-5


@functools.lru_cache(maxsize=None)
def _vmem_limit_bytes():
    # ~half of physical VMEM: ≈64 MiB on v5e/v6e (128 MiB), ≈32 MiB on v7x (64 MiB).
    try:
        cap = int(pltpu.get_tpu_info().vmem_capacity_bytes)
    except Exception:
        cap = 64 * 1024 * 1024
    return max(32 * 1024 * 1024, min(cap // 2, 96 * 1024 * 1024))


def _cparams(*semantics):
    return pltpu.CompilerParams(dimension_semantics=semantics,
                                vmem_limit_bytes=_vmem_limit_bytes())


def _row_tile(m, max_tile=512):
    """Largest multiple-of-8 divisor of m that is <= max_tile (or m itself)."""
    if m <= max_tile:
        return m
    t = max_tile - (max_tile % 8)
    while t >= 8:
        if m % t == 0:
            return t
        t -= 8
    return m


def _col_tile(n, max_tile=512):
    """Largest 256- (preferred) or 128-aligned divisor of n <= max_tile (or n)."""
    if n <= max_tile:
        return n
    for align in (256, 128):
        t = max_tile - (max_tile % align)
        while t >= align:
            if n % t == 0:
                return t
            t -= align
    return n


# ----------------------------- Pallas kernels ------------------------------ #

def _embed_kernel(src_ref, w_ref, b_ref, pos_ref, o_ref):
    # (tt, D) @ (D, H) + bias + positional encoding; f32 src cast in-kernel.
    x = src_ref[0].astype(jnp.bfloat16)
    y = jnp.dot(x, w_ref[...], preferred_element_type=jnp.float32)
    y = y + b_ref[...] + pos_ref[...]
    o_ref[0] = y.astype(o_ref.dtype)


def _mha_layer_kernel(x_ref, wq_ref, wk_ref, wv_ref, bq_ref, bk_ref, bv_ref,
                      wo_ref, bo_ref, g_ref, beta_ref, o_ref, acc_ref, *, scale):
    # Fused: per-head QKV projection + attention + out_proj (accumulated over
    # the head grid axis) + residual + LayerNorm.  grid = (batch, head).
    h = pl.program_id(1)

    @pl.when(h == 0)
    def _():
        acc_ref[...] = jnp.zeros_like(acc_ref)

    x = x_ref[0]                                                  # (T, H) bf16, VMEM-resident

    # per-head projections (qkv never written to HBM)
    q = jnp.dot(x, wq_ref[0], preferred_element_type=jnp.float32) + bq_ref[0]
    k = jnp.dot(x, wk_ref[0], preferred_element_type=jnp.float32) + bk_ref[0]
    v = jnp.dot(x, wv_ref[0], preferred_element_type=jnp.float32) + bv_ref[0]
    q = (q * scale).astype(jnp.bfloat16)
    k = k.astype(jnp.bfloat16)

    # scores + softmax (full (T,T) per head; fine for moderate T)
    s = jax.lax.dot_general(q, k, (((1,), (1,)), ((), ())),
                            preferred_element_type=jnp.float32)   # (T, T) f32
    m = jnp.max(s, axis=-1, keepdims=True)
    p = jnp.exp(s - m)
    denom = jnp.sum(p, axis=-1, keepdims=True)
    p = p * pl.reciprocal(denom, approx=True)

    attn = jnp.dot(p.astype(jnp.bfloat16), v.astype(jnp.bfloat16),
                   preferred_element_type=jnp.float32)            # (T, dh)

    # out_proj fused: this head's (dh, H) slice of W_out, accumulate over heads
    acc_ref[...] += jnp.dot(attn.astype(jnp.bfloat16), wo_ref[0],
                            preferred_element_type=jnp.float32)

    @pl.when(h == pl.num_programs(1) - 1)
    def _():
        y = acc_ref[...] + bo_ref[...] + x.astype(jnp.float32)    # + residual
        mean = jnp.mean(y, axis=-1, keepdims=True)
        var = jnp.mean((y - mean) ** 2, axis=-1, keepdims=True)
        yn = (y - mean) * jax.lax.rsqrt(var + _EPS)
        o_ref[0] = (yn * g_ref[...] + beta_ref[...]).astype(o_ref.dtype)


def _ffn_ln_kernel(x_ref, w1_ref, b1_ref, w2_ref, b2_ref, g_ref, beta_ref,
                   o_ref, acc_ref):
    # LayerNorm(x + lin2(relu(lin1(x)))), FF-chunked: per grid step compute a
    # (tm, tf) slab of the ReLU intermediate and its partial lin2 contribution.
    f = pl.program_id(1)

    @pl.when(f == 0)
    def _():
        acc_ref[...] = jnp.zeros_like(acc_ref)

    x = x_ref[...]                                                # (tm, H) bf16
    hcol = jnp.dot(x, w1_ref[...], preferred_element_type=jnp.float32)
    hcol = jnp.maximum(hcol + b1_ref[...], 0.0)
    acc_ref[...] += jnp.dot(hcol.astype(w2_ref.dtype), w2_ref[...],
                            preferred_element_type=jnp.float32)

    @pl.when(f == pl.num_programs(1) - 1)
    def _():
        y = acc_ref[...] + b2_ref[...] + x.astype(jnp.float32)
        mean = jnp.mean(y, axis=-1, keepdims=True)
        var = jnp.mean((y - mean) ** 2, axis=-1, keepdims=True)
        yn = (y - mean) * jax.lax.rsqrt(var + _EPS)
        o_ref[...] = (yn * g_ref[...] + beta_ref[...]).astype(o_ref.dtype)


def _layernorm_kernel(x_ref, g_ref, beta_ref, o_ref):
    x = x_ref[...].astype(jnp.float32)
    mean = jnp.mean(x, axis=-1, keepdims=True)
    var = jnp.mean((x - mean) ** 2, axis=-1, keepdims=True)
    xn = (x - mean) * jax.lax.rsqrt(var + _EPS)
    o_ref[...] = (xn * g_ref[...] + beta_ref[...]).astype(o_ref.dtype)


def _linear_acc_kernel(x_ref, w_ref, b_ref, o_ref, acc_ref):
    # y = x @ w + b with a K-reduction grid axis (f32 accumulator in VMEM).
    k = pl.program_id(2)

    @pl.when(k == 0)
    def _():
        acc_ref[...] = jnp.zeros_like(acc_ref)

    acc_ref[...] += jnp.dot(x_ref[...], w_ref[...],
                            preferred_element_type=jnp.float32)

    @pl.when(k == pl.num_programs(2) - 1)
    def _():
        o_ref[...] = (acc_ref[...] + b_ref[...]).astype(o_ref.dtype)


# ------------------------------ kernel wrappers ----------------------------- #

def embed(src, w, b, pos):
    """src: (B,T,D) f32; w: (D,H) bf16; b: (H,); pos: (T,H) -> (B,T,H) bf16."""
    B, T, D = src.shape
    H = w.shape[1]
    tt = _row_tile(T, max_tile=256)
    return pl.pallas_call(
        _embed_kernel,
        out_shape=jax.ShapeDtypeStruct((B, T, H), jnp.bfloat16),
        grid=(B, T // tt),
        in_specs=[
            pl.BlockSpec((1, tt, D), lambda bi, ti: (bi, ti, 0)),
            pl.BlockSpec((D, H), lambda bi, ti: (0, 0)),
            pl.BlockSpec((1, H), lambda bi, ti: (0, 0)),
            pl.BlockSpec((tt, H), lambda bi, ti: (ti, 0)),
        ],
        out_specs=pl.BlockSpec((1, tt, H), lambda bi, ti: (bi, ti, 0)),
        compiler_params=_cparams("parallel", "parallel"),
    )(src, w, b.reshape(1, H), pos)


def mha_layer(x, p, *, n_heads, scale):
    """Fused attention sub-layer: x (B,T,H) bf16 -> (B,T,H) bf16."""
    B, T, H = x.shape
    dh = H // n_heads
    return pl.pallas_call(
        functools.partial(_mha_layer_kernel, scale=scale),
        out_shape=jax.ShapeDtypeStruct((B, T, H), jnp.bfloat16),
        grid=(B, n_heads),
        in_specs=[
            pl.BlockSpec((1, T, H), lambda bi, hi: (bi, 0, 0)),    # x (resident over heads)
            pl.BlockSpec((1, H, dh), lambda bi, hi: (hi, 0, 0)),   # wq per head
            pl.BlockSpec((1, H, dh), lambda bi, hi: (hi, 0, 0)),   # wk
            pl.BlockSpec((1, H, dh), lambda bi, hi: (hi, 0, 0)),   # wv
            pl.BlockSpec((1, 1, dh), lambda bi, hi: (hi, 0, 0)),   # bq
            pl.BlockSpec((1, 1, dh), lambda bi, hi: (hi, 0, 0)),   # bk
            pl.BlockSpec((1, 1, dh), lambda bi, hi: (hi, 0, 0)),   # bv
            pl.BlockSpec((1, dh, H), lambda bi, hi: (hi, 0, 0)),   # wo per head
            pl.BlockSpec((1, H), lambda bi, hi: (0, 0)),           # bo
            pl.BlockSpec((1, H), lambda bi, hi: (0, 0)),           # norm1 gamma
            pl.BlockSpec((1, H), lambda bi, hi: (0, 0)),           # norm1 beta
        ],
        out_specs=pl.BlockSpec((1, T, H), lambda bi, hi: (bi, 0, 0)),
        scratch_shapes=[pltpu.VMEM((T, H), jnp.float32)],
        compiler_params=_cparams("parallel", "arbitrary"),
    )(x, p["wq"], p["wk"], p["wv"], p["bq"], p["bk"], p["bv"], p["wo"],
      p["bo"].reshape(1, H), p["norm1_g"].reshape(1, H), p["norm1_b"].reshape(1, H))


def ffn_layernorm(x, w1, b1, w2, b2, gamma, beta):
    """LayerNorm(x + lin2(relu(lin1(x)))); x (M,H) -> (M,H) bf16, FF-chunked."""
    M, H = x.shape
    FF = w1.shape[1]
    tm = _row_tile(M)
    tf = _col_tile(FF)
    return pl.pallas_call(
        _ffn_ln_kernel,
        out_shape=jax.ShapeDtypeStruct((M, H), jnp.bfloat16),
        grid=(M // tm, FF // tf),
        in_specs=[
            pl.BlockSpec((tm, H), lambda i, f: (i, 0)),
            pl.BlockSpec((H, tf), lambda i, f: (0, f)),
            pl.BlockSpec((1, tf), lambda i, f: (0, f)),
            pl.BlockSpec((tf, H), lambda i, f: (f, 0)),
            pl.BlockSpec((1, H), lambda i, f: (0, 0)),
            pl.BlockSpec((1, H), lambda i, f: (0, 0)),
            pl.BlockSpec((1, H), lambda i, f: (0, 0)),
        ],
        out_specs=pl.BlockSpec((tm, H), lambda i, f: (i, 0)),
        scratch_shapes=[pltpu.VMEM((tm, H), jnp.float32)],
        compiler_params=_cparams("parallel", "arbitrary"),
    )(x, w1, b1.reshape(1, FF), w2, b2.reshape(1, H),
      gamma.reshape(1, H), beta.reshape(1, H))


def layernorm(x, gamma, beta):
    """Plain LayerNorm over the last dim; x (M,H) -> (M,H) bf16."""
    M, H = x.shape
    tm = _row_tile(M)
    return pl.pallas_call(
        _layernorm_kernel,
        out_shape=jax.ShapeDtypeStruct((M, H), jnp.bfloat16),
        grid=(M // tm,),
        in_specs=[
            pl.BlockSpec((tm, H), lambda i: (i, 0)),
            pl.BlockSpec((1, H), lambda i: (0, 0)),
            pl.BlockSpec((1, H), lambda i: (0, 0)),
        ],
        out_specs=pl.BlockSpec((tm, H), lambda i: (i, 0)),
        compiler_params=_cparams("parallel"),
    )(x, gamma.reshape(1, H), beta.reshape(1, H))


def linear(x, w, b, *, out_dtype=jnp.bfloat16):
    """x (M,K) @ w (K,N) + b, tiled over M, N and the K reduction."""
    M, K = x.shape
    N = w.shape[1]
    tm, tn, tk = _row_tile(M), _col_tile(N), _col_tile(K)
    return pl.pallas_call(
        _linear_acc_kernel,
        out_shape=jax.ShapeDtypeStruct((M, N), out_dtype),
        grid=(M // tm, N // tn, K // tk),
        in_specs=[
            pl.BlockSpec((tm, tk), lambda i, j, k: (i, k)),
            pl.BlockSpec((tk, tn), lambda i, j, k: (k, j)),
            pl.BlockSpec((1, tn), lambda i, j, k: (0, j)),
        ],
        out_specs=pl.BlockSpec((tm, tn), lambda i, j, k: (i, j)),
        scratch_shapes=[pltpu.VMEM((tm, tn), jnp.float32)],
        compiler_params=_cparams("parallel", "parallel", "arbitrary"),
    )(x.astype(jnp.bfloat16), w, b.reshape(1, N))


# --------------------------- model forward (glue) --------------------------- #

def transformer_classifier_forward(src, params, *, n_heads, output_dim):
    """src: (B, T, input_dim) f32 -> (B, output_dim) f32."""
    B, T, D = src.shape
    H = params["emb_w"].shape[1]
    dh = H // n_heads
    scale = float(dh) ** -0.5          # Python float (no tracer capture)

    x = embed(src, params["emb_w"], params["emb_b"], params["pos"])    # (B,T,H) bf16

    for p in params["layers"]:
        # fused: QKV proj + per-head attention + out_proj + residual + LayerNorm
        x = mha_layer(x, p, n_heads=n_heads, scale=scale)
        # fused: lin1 + ReLU + lin2 (FF-chunked) + residual + LayerNorm
        x = ffn_layernorm(x.reshape(B * T, H), p["lin1_w"], p["lin1_b"],
                          p["lin2_w"], p["lin2_b"],
                          p["norm2_g"], p["norm2_b"]).reshape(B, T, H)

    # final encoder LayerNorm (nn.Transformer applies one)
    x2 = layernorm(x.reshape(B * T, H), params["enc_norm_g"], params["enc_norm_b"])

    # flatten (row order (b, t) matches permute-back + contiguous().view)
    flat = x2.reshape(B, T * H)
    logits = linear(flat, params["fc_w"], params["fc_b"], out_dtype=jnp.float32)
    return logits[:, :output_dim]


# ------------------------------ parameter init ------------------------------ #

def init_params(key, input_dim, hidden_dim, output_dim, n_heads, n_layers,
                num_timesteps, dim_feedforward):
    dh = hidden_dim // n_heads

    def w(k, *shape):
        return (jax.random.normal(k, shape, jnp.float32) * 0.02).astype(jnp.bfloat16)

    keys = jax.random.split(key, 2 + 6 * n_layers)
    ki = iter(keys)

    params = dict(
        emb_w=w(next(ki), input_dim, hidden_dim),
        emb_b=jnp.zeros((hidden_dim,), jnp.float32),
        pos=jnp.zeros((num_timesteps, hidden_dim), jnp.float32),   # torch.zeros init
        enc_norm_g=jnp.ones((hidden_dim,), jnp.float32),
        enc_norm_b=jnp.zeros((hidden_dim,), jnp.float32),
    )

    layers = []
    for _ in range(n_layers):
        layers.append(dict(
            wq=w(next(ki), n_heads, hidden_dim, dh),
            wk=w(next(ki), n_heads, hidden_dim, dh),
            wv=w(next(ki), n_heads, hidden_dim, dh),
            bq=jnp.zeros((n_heads, 1, dh), jnp.float32),
            bk=jnp.zeros((n_heads, 1, dh), jnp.float32),
            bv=jnp.zeros((n_heads, 1, dh), jnp.float32),
            wo=w(next(ki), n_heads, dh, hidden_dim),
            bo=jnp.zeros((hidden_dim,), jnp.float32),
            lin1_w=w(next(ki), hidden_dim, dim_feedforward),
            lin1_b=jnp.zeros((dim_feedforward,), jnp.float32),
            lin2_w=w(next(ki), dim_feedforward, hidden_dim),
            lin2_b=jnp.zeros((hidden_dim,), jnp.float32),
            norm1_g=jnp.ones((hidden_dim,), jnp.float32),
            norm1_b=jnp.zeros((hidden_dim,), jnp.float32),
            norm2_g=jnp.ones((hidden_dim,), jnp.float32),
            norm2_b=jnp.zeros((hidden_dim,), jnp.float32),
        ))
    params["layers"] = layers

    # classifier: pad the output dim to a multiple of 128 for lane-dense stores
    n_pad = ((output_dim + 127) // 128) * 128
    fc_w = w(next(ki), hidden_dim * num_timesteps, output_dim)
    fc_w_pad = jnp.zeros((hidden_dim * num_timesteps, n_pad), jnp.bfloat16)
    params["fc_w"] = fc_w_pad.at[:, :output_dim].set(fc_w)
    params["fc_b"] = jnp.zeros((n_pad,), jnp.float32)
    return params


# ---------------------------------- main ------------------------------------ #

if __name__ == "__main__":
    # small shapes: batch=2, seq(num_timesteps)=8, input_dim=16, hidden=32,
    # heads=4, layers=2, output_dim=5, dim_feedforward=2048 (PyTorch default).
    B, T, D, H = 2, 8, 16, 32
    N_HEADS, N_LAYERS, OUT_DIM, FF = 4, 2, 5, 2048

    root = jax.random.PRNGKey(0)
    k_params, k_src = jax.random.split(root)

    params = init_params(k_params, D, H, OUT_DIM, N_HEADS, N_LAYERS, T, FF)
    src = jax.random.normal(k_src, (B, T, D), jnp.float32)

    fwd = jax.jit(functools.partial(transformer_classifier_forward,
                                    n_heads=N_HEADS, output_dim=OUT_DIM))
    out = jax.block_until_ready(fwd(src, params))

    assert out.shape == (B, OUT_DIM), out.shape
    assert bool(jnp.all(jnp.isfinite(out))), "non-finite output"
    print("KERNEL_OK")
</pallas_src>

<mosaic_0001>
module attributes {stable_mosaic.version = 11 : i64} {
  func.func @_embed_kernel(%arg0: i32, %arg1: i32, %arg2: memref<1x8x16xf32, #tpu.memory_space<vmem>>, %arg3: memref<16x32xbf16, #tpu.memory_space<vmem>>, %arg4: memref<1x32xf32, #tpu.memory_space<vmem>>, %arg5: memref<8x32xf32, #tpu.memory_space<vmem>>, %arg6: memref<1x8x32xbf16, #tpu.memory_space<vmem>>) attributes {dimension_semantics = [#tpu.dimension_semantics<parallel>, #tpu.dimension_semantics<parallel>], iteration_bounds = array<i64: 2, 1>, scalar_prefetch = 0 : i64, scratch_operands = 0 : i64, tpu.core_type = #tpu.core_type<tc>, window_params = [{transform_indices = @transform_0, window_bounds = array<i64: 1, 8, 16>}, {pipeline_mode = #tpu.pipeline_mode<synchronous>, transform_indices = @transform_1, window_bounds = array<i64: 16, 32>}, {pipeline_mode = #tpu.pipeline_mode<synchronous>, transform_indices = @transform_2, window_bounds = array<i64: 1, 32>}, {transform_indices = @transform_3, window_bounds = array<i64: 8, 32>}, {transform_indices = @transform_4, window_bounds = array<i64: 1, 8, 32>}]} {
    %c0 = arith.constant 0 : index
    %c0_0 = arith.constant 0 : index
    %c0_1 = arith.constant 0 : index
    %0 = vector.load %arg2[%c0, %c0_0, %c0_1] : memref<1x8x16xf32, #tpu.memory_space<vmem>>, vector<1x8x16xf32>
    %1 = vector.shape_cast %0 : vector<1x8x16xf32> to vector<8x16xf32>
    %2 = arith.truncf %1 : vector<8x16xf32> to vector<8x16xbf16>
    %c0_2 = arith.constant 0 : index
    %c0_3 = arith.constant 0 : index
    %3 = vector.load %arg3[%c0_2, %c0_3] : memref<16x32xbf16, #tpu.memory_space<vmem>>, vector<16x32xbf16>
    %cst = arith.constant dense<0.000000e+00> : vector<8x32xf32>
    %4 = tpu.matmul %2, %3, %cst {dimension_numbers = #tpu.dot_dimension_numbers<[1], [0], [0], [1], [0, 0, 1, 1], [], []>} : vector<8x16xbf16>, vector<16x32xbf16>, vector<8x32xf32> -> vector<8x32xf32>
    %c0_4 = arith.constant 0 : index
    %c0_5 = arith.constant 0 : index
    %5 = vector.load %arg4[%c0_4, %c0_5] : memref<1x32xf32, #tpu.memory_space<vmem>>, vector<1x32xf32>
    %6 = vector.broadcast %5 : vector<1x32xf32> to vector<8x32xf32>
    %7 = arith.addf %4, %6 : vector<8x32xf32>
    %c0_6 = arith.constant 0 : index
    %c0_7 = arith.constant 0 : index
    %8 = vector.load %arg5[%c0_6, %c0_7] : memref<8x32xf32, #tpu.memory_space<vmem>>, vector<8x32xf32>
    %9 = arith.addf %7, %8 : vector<8x32xf32>
    %10 = arith.truncf %9 : vector<8x32xf32> to vector<8x32xbf16>
    %c0_8 = arith.constant 0 : index
    %c0_9 = arith.constant 0 : index
    %c0_10 = arith.constant 0 : index
    %11 = vector.load %arg6[%c0_8, %c0_9, %c0_10] : memref<1x8x32xbf16, #tpu.memory_space<vmem>>, vector<1x8x32xbf16>
    %12 = vector.shape_cast %11 : vector<1x8x32xbf16> to vector<8x32xbf16>
    %13 = vector.shape_cast %10 : vector<8x32xbf16> to vector<1x8x32xbf16>
    tpu.vector_store %arg6[%c0_8, %c0_9, %c0_10], %13 {strides = array<i32>} : memref<1x8x32xbf16, #tpu.memory_space<vmem>>, vector<1x8x32xbf16>,
    return
  }
  func.func @transform_0(%arg0: i32, %arg1: i32) -> (i32, i32, i32) {
    %c0_i32 = arith.constant 0 : i32
    %c0_i32_0 = arith.constant 0 : i32
    return %arg0, %arg1, %c0_i32 : i32, i32, i32
  }
  func.func @transform_1(%arg0: i32, %arg1: i32) -> (i32, i32) {
    %c0_i32 = arith.constant 0 : i32
    %c0_i32_0 = arith.constant 0 : i32
    %c0_i32_1 = arith.constant 0 : i32
    return %c0_i32, %c0_i32_0 : i32, i32
  }
  func.func @transform_2(%arg0: i32, %arg1: i32) -> (i32, i32) {
    %c0_i32 = arith.constant 0 : i32
    %c0_i32_0 = arith.constant 0 : i32
    %c0_i32_1 = arith.constant 0 : i32
    return %c0_i32, %c0_i32_0 : i32, i32
  }
  func.func @transform_3(%arg0: i32, %arg1: i32) -> (i32, i32) {
    %c0_i32 = arith.constant 0 : i32
    %c0_i32_0 = arith.constant 0 : i32
    return %arg1, %c0_i32 : i32, i32
  }
  func.func @transform_4(%arg0: i32, %arg1: i32) -> (i32, i32, i32) {
    %c0_i32 = arith.constant 0 : i32
    %c0_i32_0 = arith.constant 0 : i32
    return %arg0, %arg1, %c0_i32 : i32, i32, i32
  }
}

module attributes {stable_mosaic.version = 11 : i64} {
  func.func @_mha_layer_kernel(%arg0: i32, %arg1: i32, %arg2: memref<1x8x32xbf16, #tpu.memory_space<vmem>>, %arg3: memref<1x32x8xbf16, #tpu.memory_space<vmem>>, %arg4: memref<1x32x8xbf16, #tpu.memory_space<vmem>>, %arg5: memref<1x32x8xbf16, #tpu.memory_space<vmem>>, %arg6: memref<1x1x8xf32, #tpu.memory_space<vmem>>, %arg7: memref<1x1x8xf32, #tpu.memory_space<vmem>>, %arg8: memref<1x1x8xf32, #tpu.memory_space<vmem>>, %arg9: memref<1x8x32xbf16, #tpu.memory_space<vmem>>, %arg10: memref<1x32xf32, #tpu.memory_space<vmem>>, %arg11: memref<1x32xf32, #tpu.memory_space<vmem>>, %arg12: memref<1x32xf32, #tpu.memory_space<vmem>>, %arg13: memref<1x8x32xbf16, #tpu.memory_space<vmem>>, %arg14: memref<8x32xf32, #tpu.memory_space<vmem>>) attributes {dimension_semantics = [#tpu.dimension_semantics<parallel>, #tpu.dimension_semantics<arbitrary>], iteration_bounds = array<i64: 2, 4>, scalar_prefetch = 0 : i64, scratch_operands = 1 : i64, tpu.core_type = #tpu.core_type<tc>, window_params = [{transform_indices = @transform_0, window_bounds = array<i64: 1, 8, 32>}, {transform_indices = @transform_1, window_bounds = array<i64: 1, 32, 8>}, {transform_indices = @transform_2, window_bounds = array<i64: 1, 32, 8>}, {transform_indices = @transform_3, window_bounds = array<i64: 1, 32, 8>}, {transform_indices = @transform_4, window_bounds = array<i64: 1, 1, 8>}, {transform_indices = @transform_5, window_bounds = array<i64: 1, 1, 8>}, {transform_indices = @transform_6, window_bounds = array<i64: 1, 1, 8>}, {transform_indices = @transform_7, window_bounds = array<i64: 1, 8, 32>}, {pipeline_mode = #tpu.pipeline_mode<synchronous>, transform_indices = @transform_8, window_bounds = array<i64: 1, 32>}, {pipeline_mode = #tpu.pipeline_mode<synchronous>, transform_indices = @transform_9, window_bounds = array<i64: 1, 32>}, {pipeline_mode = #tpu.pipeline_mode<synchronous>, transform_indices = @transform_10, window_bounds = array<i64: 1, 32>}, {transform_indices = @transform_11, window_bounds = array<i64: 1, 8, 32>}]} {
    %c0_i32 = arith.constant 0 : i32
    %0 = arith.cmpi eq, %arg1, %c0_i32 : i32
    %1 = arith.extui %0 : i1 to i32
    %c0_i32_0 = arith.constant 0 : i32
    %2 = arith.cmpi ne, %1, %c0_i32_0 : i32
    scf.if %2 {
      %cst_37 = arith.constant 0.000000e+00 : f32
      %54 = vector.broadcast %cst_37 : f32 to vector<8x32xf32>
      %c0_38 = arith.constant 0 : index
      %c0_39 = arith.constant 0 : index
      %55 = vector.load %arg14[%c0_38, %c0_39] : memref<8x32xf32, #tpu.memory_space<vmem>>, vector<8x32xf32>
      tpu.vector_store %arg14[%c0_38, %c0_39], %54 {strides = array<i32>} : memref<8x32xf32, #tpu.memory_space<vmem>>, vector<8x32xf32>,
    } else {
    }
    %c0 = arith.constant 0 : index
    %c0_1 = arith.constant 0 : index
    %c0_2 = arith.constant 0 : index
    %3 = vector.load %arg2[%c0, %c0_1, %c0_2] : memref<1x8x32xbf16, #tpu.memory_space<vmem>>, vector<1x8x32xbf16>
    %4 = vector.shape_cast %3 : vector<1x8x32xbf16> to vector<8x32xbf16>
    %c0_3 = arith.constant 0 : index
    %c0_4 = arith.constant 0 : index
    %c0_5 = arith.constant 0 : index
    %5 = vector.load %arg3[%c0_3, %c0_4, %c0_5] : memref<1x32x8xbf16, #tpu.memory_space<vmem>>, vector<1x32x8xbf16>
    %6 = vector.shape_cast %5 : vector<1x32x8xbf16> to vector<32x8xbf16>
    %cst = arith.constant dense<0.000000e+00> : vector<8x8xf32>
    %7 = tpu.matmul %4, %6, %cst {dimension_numbers = #tpu.dot_dimension_numbers<[1], [0], [0], [1], [0, 0, 1, 1], [], []>} : vector<8x32xbf16>, vector<32x8xbf16>, vector<8x8xf32> -> vector<8x8xf32>
    %c0_6 = arith.constant 0 : index
    %c0_7 = arith.constant 0 : index
    %c0_8 = arith.constant 0 : index
    %8 = vector.load %arg6[%c0_6, %c0_7, %c0_8] : memref<1x1x8xf32, #tpu.memory_space<vmem>>, vector<1x1x8xf32>
    %9 = vector.shape_cast %8 : vector<1x1x8xf32> to vector<1x8xf32>
    %10 = vector.broadcast %9 : vector<1x8xf32> to vector<8x8xf32>
    %11 = arith.addf %7, %10 : vector<8x8xf32>
    %c0_9 = arith.constant 0 : index
    %c0_10 = arith.constant 0 : index
    %c0_11 = arith.constant 0 : index
    %12 = vector.load %arg4[%c0_9, %c0_10, %c0_11] : memref<1x32x8xbf16, #tpu.memory_space<vmem>>, vector<1x32x8xbf16>
    %13 = vector.shape_cast %12 : vector<1x32x8xbf16> to vector<32x8xbf16>
    %cst_12 = arith.constant dense<0.000000e+00> : vector<8x8xf32>
    %14 = tpu.matmul %4, %13, %cst_12 {dimension_numbers = #tpu.dot_dimension_numbers<[1], [0], [0], [1], [0, 0, 1, 1], [], []>} : vector<8x32xbf16>, vector<32x8xbf16>, vector<8x8xf32> -> vector<8x8xf32>
    %c0_13 = arith.constant 0 : index
    %c0_14 = arith.constant 0 : index
    %c0_15 = arith.constant 0 : index
    %15 = vector.load %arg7[%c0_13, %c0_14, %c0_15] : memref<1x1x8xf32, #tpu.memory_space<vmem>>, vector<1x1x8xf32>
    %16 = vector.shape_cast %15 : vector<1x1x8xf32> to vector<1x8xf32>
    %17 = vector.broadcast %16 : vector<1x8xf32> to vector<8x8xf32>
    %18 = arith.addf %14, %17 : vector<8x8xf32>
    %c0_16 = arith.constant 0 : index
    %c0_17 = arith.constant 0 : index
    %c0_18 = arith.constant 0 : index
    %19 = vector.load %arg5[%c0_16, %c0_17, %c0_18] : memref<1x32x8xbf16, #tpu.memory_space<vmem>>, vector<1x32x8xbf16>
    %20 = vector.shape_cast %19 : vector<1x32x8xbf16> to vector<32x8xbf16>
    %cst_19 = arith.constant dense<0.000000e+00> : vector<8x8xf32>
    %21 = tpu.matmul %4, %20, %cst_19 {dimension_numbers = #tpu.dot_dimension_numbers<[1], [0], [0], [1], [0, 0, 1, 1], [], []>} : vector<8x32xbf16>, vector<32x8xbf16>, vector<8x8xf32> -> vector<8x8xf32>
    %c0_20 = arith.constant 0 : index
    %c0_21 = arith.constant 0 : index
    %c0_22 = arith.constant 0 : index
    %22 = vector.load %arg8[%c0_20, %c0_21, %c0_22] : memref<1x1x8xf32, #tpu.memory_space<vmem>>, vector<1x1x8xf32>
    %23 = vector.shape_cast %22 : vector<1x1x8xf32> to vector<1x8xf32>
    %24 = vector.broadcast %23 : vector<1x8xf32> to vector<8x8xf32>
    %25 = arith.addf %21, %24 : vector<8x8xf32>
    %cst_23 = arith.constant 0.353553385 : f32
    %26 = vector.broadcast %cst_23 : f32 to vector<8x8xf32>
    %27 = arith.mulf %11, %26 : vector<8x8xf32>
    %28 = arith.truncf %27 : vector<8x8xf32> to vector<8x8xbf16>
    %29 = arith.truncf %18 : vector<8x8xf32> to vector<8x8xbf16>
    %cst_24 = arith.constant dense<0.000000e+00> : vector<8x8xf32>
    %30 = tpu.matmul %28, %29, %cst_24 {dimension_numbers = #tpu.dot_dimension_numbers<[1], [1], [0], [0], [0, 0, 1, 0], [], []>} : vector<8x8xbf16>, vector<8x8xbf16>, vector<8x8xf32> -> vector<8x8xf32>
    %cst_25 = arith.constant dense<0xFF800000> : vector<8xf32>
    %31 = vector.multi_reduction <maximumf>, %30, %cst_25 [1] : vector<8x8xf32> to vector<8xf32>
    %32 = vector.shape_cast %31 : vector<8xf32> to vector<8x1xf32>
    %33 = vector.broadcast %32 : vector<8x1xf32> to vector<8x8xf32>
    %34 = arith.subf %30, %33 : vector<8x8xf32>
    %35 = math.exp %34 : vector<8x8xf32>
    %cst_26 = arith.constant dense<0.000000e+00> : vector<8xf32>
    %36 = vector.multi_reduction <add>, %35, %cst_26 [1] : vector<8x8xf32> to vector<8xf32>
    %37 = vector.shape_cast %36 : vector<8xf32> to vector<8x1xf32>
    %38 = tpu.reciprocal %37 {approx = true} : vector<8x1xf32> -> vector<8x1xf32>
    %39 = vector.broadcast %38 : vector<8x1xf32> to vector<8x8xf32>
    %40 = arith.mulf %35, %39 : vector<8x8xf32>
    %41 = arith.truncf %40 : vector<8x8xf32> to vector<8x8xbf16>
    %42 = arith.truncf %25 : vector<8x8xf32> to vector<8x8xbf16>
    %cst_27 = arith.constant dense<0.000000e+00> : vector<8x8xf32>
    %43 = tpu.matmul %41, %42, %cst_27 {dimension_numbers = #tpu.dot_dimension_numbers<[1], [0], [0], [1], [0, 0, 1, 1], [], []>} : vector<8x8xbf16>, vector<8x8xbf16>, vector<8x8xf32> -> vector<8x8xf32>
    %c0_28 = arith.constant 0 : index
    %c0_29 = arith.constant 0 : index
    %44 = vector.load %arg14[%c0_28, %c0_29] : memref<8x32xf32, #tpu.memory_space<vmem>>, vector<8x32xf32>
    %45 = arith.truncf %43 : vector<8x8xf32> to vector<8x8xbf16>
    %c0_30 = arith.constant 0 : index
    %c0_31 = arith.constant 0 : index
    %c0_32 = arith.constant 0 : index
    %46 = vector.load %arg9[%c0_30, %c0_31, %c0_32] : memref<1x8x32xbf16, #tpu.memory_space<vmem>>, vector<1x8x32xbf16>
    %47 = vector.shape_cast %46 : vector<1x8x32xbf16> to vector<8x32xbf16>
    %cst_33 = arith.constant dense<0.000000e+00> : vector<8x32xf32>
    %48 = tpu.matmul %45, %47, %cst_33 {dimension_numbers = #tpu.dot_dimension_numbers<[1], [0], [0], [1], [0, 0, 1, 1], [], []>} : vector<8x8xbf16>, vector<8x32xbf16>, vector<8x32xf32> -> vector<8x32xf32>
    %49 = arith.addf %44, %48 : vector<8x32xf32>
    %c0_34 = arith.constant 0 : index
    %c0_35 = arith.constant 0 : index
    %50 = vector.load %arg14[%c0_34, %c0_35] : memref<8x32xf32, #tpu.memory_space<vmem>>, vector<8x32xf32>
    tpu.vector_store %arg14[%c0_34, %c0_35], %49 {strides = array<i32>} : memref<8x32xf32, #tpu.memory_space<vmem>>, vector<8x32xf32>,
    %c3_i32 = arith.constant 3 : i32
    %51 = arith.cmpi eq, %arg1, %c3_i32 : i32
    %52 = arith.extui %51 : i1 to i32
    %c0_i32_36 = arith.constant 0 : i32
    %53 = arith.cmpi ne, %52, %c0_i32_36 : i32
    scf.if %53 {
      %c0_37 = arith.constant 0 : index
      %c0_38 = arith.constant 0 : index
      %54 = vector.load %arg14[%c0_37, %c0_38] : memref<8x32xf32, #tpu.memory_space<vmem>>, vector<8x32xf32>
      %c0_39 = arith.constant 0 : index
      %c0_40 = arith.constant 0 : index
      %55 = vector.load %arg10[%c0_39, %c0_40] : memref<1x32xf32, #tpu.memory_space<vmem>>, vector<1x32xf32>
      %56 = vector.broadcast %55 : vector<1x32xf32> to vector<8x32xf32>
      %57 = arith.addf %54, %56 : vector<8x32xf32>
      %58 = arith.extf %4 : vector<8x32xbf16> to vector<8x32xf32>
      %59 = arith.addf %57, %58 : vector<8x32xf32>
      %cst_41 = arith.constant dense<0.000000e+00> : vector<8xf32>
      %60 = vector.multi_reduction <add>, %59, %cst_41 [1] : vector<8x32xf32> to vector<8xf32>
      %61 = vector.shape_cast %60 : vector<8xf32> to vector<8x1xf32>
      %cst_42 = arith.constant 3.200000e+01 : f32
      %62 = vector.broadcast %cst_42 : f32 to vector<8x1xf32>
      %63 = arith.divf %61, %62 : vector<8x1xf32>
      %64 = vector.broadcast %63 : vector<8x1xf32> to vector<8x32xf32>
      %65 = arith.subf %59, %64 : vector<8x32xf32>
      %66 = arith.mulf %65, %65 : vector<8x32xf32>
      %cst_43 = arith.constant dense<0.000000e+00> : vector<8xf32>
      %67 = vector.multi_reduction <add>, %66, %cst_43 [1] : vector<8x32xf32> to vector<8xf32>
      %68 = vector.shape_cast %67 : vector<8xf32> to vector<8x1xf32>
      %cst_44 = arith.constant 3.200000e+01 : f32
      %69 = vector.broadcast %cst_44 : f32 to vector<8x1xf32>
      %70 = arith.divf %68, %69 : vector<8x1xf32>
      %71 = vector.broadcast %63 : vector<8x1xf32> to vector<8x32xf32>
      %72 = arith.subf %59, %71 : vector<8x32xf32>
      %cst_45 = arith.constant 9.99999974E-6 : f32
      %73 = vector.broadcast %cst_45 : f32 to vector<8x1xf32>
      %74 = arith.addf %70, %73 : vector<8x1xf32>
      %75 = math.rsqrt %74 : vector<8x1xf32>
      %76 = vector.broadcast %75 : vector<8x1xf32> to vector<8x32xf32>
      %77 = arith.mulf %72, %76 : vector<8x32xf32>
      %c0_46 = arith.constant 0 : index
      %c0_47 = arith.constant 0 : index
      %78 = vector.load %arg11[%c0_46, %c0_47] : memref<1x32xf32, #tpu.memory_space<vmem>>, vector<1x32xf32>
      %79 = vector.broadcast %78 : vector<1x32xf32> to vector<8x32xf32>
      %80 = arith.mulf %77, %79 : vector<8x32xf32>
      %c0_48 = arith.constant 0 : index
      %c0_49 = arith.constant 0 : index
      %81 = vector.load %arg12[%c0_48, %c0_49] : memref<1x32xf32, #tpu.memory_space<vmem>>, vector<1x32xf32>
      %82 = vector.broadcast %81 : vector<1x32xf32> to vector<8x32xf32>
      %83 = arith.addf %80, %82 : vector<8x32xf32>
      %84 = arith.truncf %83 : vector<8x32xf32> to vector<8x32xbf16>
      %c0_50 = arith.constant 0 : index
      %c0_51 = arith.constant 0 : index
      %c0_52 = arith.constant 0 : index
      %85 = vector.load %arg13[%c0_50, %c0_51, %c0_52] : memref<1x8x32xbf16, #tpu.memory_space<vmem>>, vector<1x8x32xbf16>
      %86 = vector.shape_cast %85 : vector<1x8x32xbf16> to vector<8x32xbf16>
      %87 = vector.shape_cast %84 : vector<8x32xbf16> to vector<1x8x32xbf16>
      tpu.vector_store %arg13[%c0_50, %c0_51, %c0_52], %87 {strides = array<i32>} : memref<1x8x32xbf16, #tpu.memory_space<vmem>>, vector<1x8x32xbf16>,
    } else {
    }
    return
  }
  func.func @transform_0(%arg0: i32, %arg1: i32) -> (i32, i32, i32) {
    %c0_i32 = arith.constant 0 : i32
    %c0_i32_0 = arith.constant 0 : i32
    %c0_i32_1 = arith.constant 0 : i32
    return %arg0, %c0_i32, %c0_i32_0 : i32, i32, i32
  }
  func.func @transform_1(%arg0: i32, %arg1: i32) -> (i32, i32, i32) {
    %c0_i32 = arith.constant 0 : i32
    %c0_i32_0 = arith.constant 0 : i32
    %c0_i32_1 = arith.constant 0 : i32
    return %arg1, %c0_i32, %c0_i32_0 : i32, i32, i32
  }
  func.func @transform_2(%arg0: i32, %arg1: i32) -> (i32, i32, i32) {
    %c0_i32 = arith.constant 0 : i32
    %c0_i32_0 = arith.constant 0 : i32
    %c0_i32_1 = arith.constant 0 : i32
    return %arg1, %c0_i32, %c0_i32_0 : i32, i32, i32
  }
  func.func @transform_3(%arg0: i32, %arg1: i32) -> (i32, i32, i32) {
    %c0_i32 = arith.constant 0 : i32
    %c0_i32_0 = arith.constant 0 : i32
    %c0_i32_1 = arith.constant 0 : i32
    return %arg1, %c0_i32, %c0_i32_0 : i32, i32, i32
  }
  func.func @transform_4(%arg0: i32, %arg1: i32) -> (i32, i32, i32) {
    %c0_i32 = arith.constant 0 : i32
    %c0_i32_0 = arith.constant 0 : i32
    %c0_i32_1 = arith.constant 0 : i32
    return %arg1, %c0_i32, %c0_i32_0 : i32, i32, i32
  }
  func.func @transform_5(%arg0: i32, %arg1: i32) -> (i32, i32, i32) {
    %c0_i32 = arith.constant 0 : i32
    %c0_i32_0 = arith.constant 0 : i32
    %c0_i32_1 = arith.constant 0 : i32
    return %arg1, %c0_i32, %c0_i32_0 : i32, i32, i32
  }
  func.func @transform_6(%arg0: i32, %arg1: i32) -> (i32, i32, i32) {
    %c0_i32 = arith.constant 0 : i32
    %c0_i32_0 = arith.constant 0 : i32
    %c0_i32_1 = arith.constant 0 : i32
    return %arg1, %c0_i32, %c0_i32_0 : i32, i32, i32
  }
  func.func @transform_7(%arg0: i32, %arg1: i32) -> (i32, i32, i32) {
    %c0_i32 = arith.constant 0 : i32
    %c0_i32_0 = arith.constant 0 : i32
    %c0_i32_1 = arith.constant 0 : i32
    return %arg1, %c0_i32, %c0_i32_0 : i32, i32, i32
  }
  func.func @transform_8(%arg0: i32, %arg1: i32) -> (i32, i32) {
    %c0_i32 = arith.constant 0 : i32
    %c0_i32_0 = arith.constant 0 : i32
    %c0_i32_1 = arith.constant 0 : i32
    return %c0_i32, %c0_i32_0 : i32, i32
  }
  func.func @transform_9(%arg0: i32, %arg1: i32) -> (i32, i32) {
    %c0_i32 = arith.constant 0 : i32
    %c0_i32_0 = arith.constant 0 : i32
    %c0_i32_1 = arith.constant 0 : i32
    return %c0_i32, %c0_i32_0 : i32, i32
  }
  func.func @transform_10(%arg0: i32, %arg1: i32) -> (i32, i32) {
    %c0_i32 = arith.constant 0 : i32
    %c0_i32_0 = arith.constant 0 : i32
    %c0_i32_1 = arith.constant 0 : i32
    return %c0_i32, %c0_i32_0 : i32, i32
  }
  func.func @transform_11(%arg0: i32, %arg1: i32) -> (i32, i32, i32) {
    %c0_i32 = arith.constant 0 : i32
    %c0_i32_0 = arith.constant 0 : i32
    %c0_i32_1 = arith.constant 0 : i32
    return %arg0, %c0_i32, %c0_i32_0 : i32, i32, i32
  }
}

module attributes {stable_mosaic.version = 11 : i64} {
  func.func @_ffn_ln_kernel(%arg0: i32, %arg1: i32, %arg2: memref<16x32xbf16, #tpu.memory_space<vmem>>, %arg3: memref<32x512xbf16, #tpu.memory_space<vmem>>, %arg4: memref<1x512xf32, #tpu.memory_space<vmem>>, %arg5: memref<512x32xbf16, #tpu.memory_space<vmem>>, %arg6: memref<1x32xf32, #tpu.memory_space<vmem>>, %arg7: memref<1x32xf32, #tpu.memory_space<vmem>>, %arg8: memref<1x32xf32, #tpu.memory_space<vmem>>, %arg9: memref<16x32xbf16, #tpu.memory_space<vmem>>, %arg10: memref<16x32xf32, #tpu.memory_space<vmem>>) attributes {dimension_semantics = [#tpu.dimension_semantics<parallel>, #tpu.dimension_semantics<arbitrary>], iteration_bounds = array<i64: 1, 4>, scalar_prefetch = 0 : i64, scratch_operands = 1 : i64, tpu.core_type = #tpu.core_type<tc>, window_params = [{transform_indices = @transform_0, window_bounds = array<i64: 16, 32>}, {transform_indices = @transform_1, window_bounds = array<i64: 32, 512>}, {transform_indices = @transform_2, window_bounds = array<i64: 1, 512>}, {transform_indices = @transform_3, window_bounds = array<i64: 512, 32>}, {pipeline_mode = #tpu.pipeline_mode<synchronous>, transform_indices = @transform_4, window_bounds = array<i64: 1, 32>}, {pipeline_mode = #tpu.pipeline_mode<synchronous>, transform_indices = @transform_5, window_bounds = array<i64: 1, 32>}, {pipeline_mode = #tpu.pipeline_mode<synchronous>, transform_indices = @transform_6, window_bounds = array<i64: 1, 32>}, {transform_indices = @transform_7, window_bounds = array<i64: 16, 32>}]} {
    %c0_i32 = arith.constant 0 : i32
    %0 = arith.cmpi eq, %arg1, %c0_i32 : i32
    %1 = arith.extui %0 : i1 to i32
    %c0_i32_0 = arith.constant 0 : i32
    %2 = arith.cmpi ne, %1, %c0_i32_0 : i32
    scf.if %2 {
      %cst_15 = arith.constant 0.000000e+00 : f32
      %20 = vector.broadcast %cst_15 : f32 to vector<16x32xf32>
      %c0_16 = arith.constant 0 : index
      %c0_17 = arith.constant 0 : index
      %21 = vector.load %arg10[%c0_16, %c0_17] : memref<16x32xf32, #tpu.memory_space<vmem>>, vector<16x32xf32>
      tpu.vector_store %arg10[%c0_16, %c0_17], %20 {strides = array<i32>} : memref<16x32xf32, #tpu.memory_space<vmem>>, vector<16x32xf32>,
    } else {
    }
    %c0 = arith.constant 0 : index
    %c0_1 = arith.constant 0 : index
    %3 = vector.load %arg2[%c0, %c0_1] : memref<16x32xbf16, #tpu.memory_space<vmem>>, vector<16x32xbf16>
    %c0_2 = arith.constant 0 : index
    %c0_3 = arith.constant 0 : index
    %4 = vector.load %arg3[%c0_2, %c0_3] : memref<32x512xbf16, #tpu.memory_space<vmem>>, vector<32x512xbf16>
    %cst = arith.constant dense<0.000000e+00> : vector<16x512xf32>
    %5 = tpu.matmul %3, %4, %cst {dimension_numbers = #tpu.dot_dimension_numbers<[1], [0], [0], [1], [0, 0, 1, 1], [], []>} : vector<16x32xbf16>, vector<32x512xbf16>, vector<16x512xf32> -> vector<16x512xf32>
    %c0_4 = arith.constant 0 : index
    %c0_5 = arith.constant 0 : index
    %6 = vector.load %arg4[%c0_4, %c0_5] : memref<1x512xf32, #tpu.memory_space<vmem>>, vector<1x512xf32>
    %7 = vector.broadcast %6 : vector<1x512xf32> to vector<16x512xf32>
    %8 = arith.addf %5, %7 : vector<16x512xf32>
    %cst_6 = arith.constant 0.000000e+00 : f32
    %9 = vector.broadcast %cst_6 : f32 to vector<16x512xf32>
    %10 = arith.maximumf %8, %9 : vector<16x512xf32>
    %c0_7 = arith.constant 0 : index
    %c0_8 = arith.constant 0 : index
    %11 = vector.load %arg10[%c0_7, %c0_8] : memref<16x32xf32, #tpu.memory_space<vmem>>, vector<16x32xf32>
    %12 = arith.truncf %10 : vector<16x512xf32> to vector<16x512xbf16>
    %c0_9 = arith.constant 0 : index
    %c0_10 = arith.constant 0 : index
    %13 = vector.load %arg5[%c0_9, %c0_10] : memref<512x32xbf16, #tpu.memory_space<vmem>>, vector<512x32xbf16>
    %cst_11 = arith.constant dense<0.000000e+00> : vector<16x32xf32>
    %14 = tpu.matmul %12, %13, %cst_11 {dimension_numbers = #tpu.dot_dimension_numbers<[1], [0], [0], [1], [0, 0, 1, 1], [], []>} : vector<16x512xbf16>, vector<512x32xbf16>, vector<16x32xf32> -> vector<16x32xf32>
    %15 = arith.addf %11, %14 : vector<16x32xf32>
    %c0_12 = arith.constant 0 : index
    %c0_13 = arith.constant 0 : index
    %16 = vector.load %arg10[%c0_12, %c0_13] : memref<16x32xf32, #tpu.memory_space<vmem>>, vector<16x32xf32>
    tpu.vector_store %arg10[%c0_12, %c0_13], %15 {strides = array<i32>} : memref<16x32xf32, #tpu.memory_space<vmem>>, vector<16x32xf32>,
    %c3_i32 = arith.constant 3 : i32
    %17 = arith.cmpi eq, %arg1, %c3_i32 : i32
    %18 = arith.extui %17 : i1 to i32
    %c0_i32_14 = arith.constant 0 : i32
    %19 = arith.cmpi ne, %18, %c0_i32_14 : i32
    scf.if %19 {
      %c0_15 = arith.constant 0 : index
      %c0_16 = arith.constant 0 : index
      %20 = vector.load %arg10[%c0_15, %c0_16] : memref<16x32xf32, #tpu.memory_space<vmem>>, vector<16x32xf32>
      %c0_17 = arith.constant 0 : index
      %c0_18 = arith.constant 0 : index
      %21 = vector.load %arg6[%c0_17, %c0_18] : memref<1x32xf32, #tpu.memory_space<vmem>>, vector<1x32xf32>
      %22 = vector.broadcast %21 : vector<1x32xf32> to vector<16x32xf32>
      %23 = arith.addf %20, %22 : vector<16x32xf32>
      %24 = arith.extf %3 : vector<16x32xbf16> to vector<16x32xf32>
      %25 = arith.addf %23, %24 : vector<16x32xf32>
      %cst_19 = arith.constant dense<0.000000e+00> : vector<16xf32>
      %26 = vector.multi_reduction <add>, %25, %cst_19 [1] : vector<16x32xf32> to vector<16xf32>
      %27 = vector.shape_cast %26 : vector<16xf32> to vector<16x1xf32>
      %cst_20 = arith.constant 3.200000e+01 : f32
      %28 = vector.broadcast %cst_20 : f32 to vector<16x1xf32>
      %29 = arith.divf %27, %28 : vector<16x1xf32>
      %30 = vector.broadcast %29 : vector<16x1xf32> to vector<16x32xf32>
      %31 = arith.subf %25, %30 : vector<16x32xf32>
      %32 = arith.mulf %31, %31 : vector<16x32xf32>
      %cst_21 = arith.constant dense<0.000000e+00> : vector<16xf32>
      %33 = vector.multi_reduction <add>, %32, %cst_21 [1] : vector<16x32xf32> to vector<16xf32>
      %34 = vector.shape_cast %33 : vector<16xf32> to vector<16x1xf32>
      %cst_22 = arith.constant 3.200000e+01 : f32
      %35 = vector.broadcast %cst_22 : f32 to vector<16x1xf32>
      %36 = arith.divf %34, %35 : vector<16x1xf32>
      %37 = vector.broadcast %29 : vector<16x1xf32> to vector<16x32xf32>
      %38 = arith.subf %25, %37 : vector<16x32xf32>
      %cst_23 = arith.constant 9.99999974E-6 : f32
      %39 = vector.broadcast %cst_23 : f32 to vector<16x1xf32>
      %40 = arith.addf %36, %39 : vector<16x1xf32>
      %41 = math.rsqrt %40 : vector<16x1xf32>
      %42 = vector.broadcast %41 : vector<16x1xf32> to vector<16x32xf32>
      %43 = arith.mulf %38, %42 : vector<16x32xf32>
      %c0_24 = arith.constant 0 : index
      %c0_25 = arith.constant 0 : index
      %44 = vector.load %arg7[%c0_24, %c0_25] : memref<1x32xf32, #tpu.memory_space<vmem>>, vector<1x32xf32>
      %45 = vector.broadcast %44 : vector<1x32xf32> to vector<16x32xf32>
      %46 = arith.mulf %43, %45 : vector<16x32xf32>
      %c0_26 = arith.constant 0 : index
      %c0_27 = arith.constant 0 : index
      %47 = vector.load %arg8[%c0_26, %c0_27] : memref<1x32xf32, #tpu.memory_space<vmem>>, vector<1x32xf32>
      %48 = vector.broadcast %47 : vector<1x32xf32> to vector<16x32xf32>
      %49 = arith.addf %46, %48 : vector<16x32xf32>
      %50 = arith.truncf %49 : vector<16x32xf32> to vector<16x32xbf16>
      %c0_28 = arith.constant 0 : index
      %c0_29 = arith.constant 0 : index
      %51 = vector.load %arg9[%c0_28, %c0_29] : memref<16x32xbf16, #tpu.memory_space<vmem>>, vector<16x32xbf16>
      tpu.vector_store %arg9[%c0_28, %c0_29], %50 {strides = array<i32>} : memref<16x32xbf16, #tpu.memory_space<vmem>>, vector<16x32xbf16>,
    } else {
    }
    return
  }
  func.func @transform_0(%arg0: i32, %arg1: i32) -> (i32, i32) {
    %c0_i32 = arith.constant 0 : i32
    %c0_i32_0 = arith.constant 0 : i32
    return %arg0, %c0_i32 : i32, i32
  }
  func.func @transform_1(%arg0: i32, %arg1: i32) -> (i32, i32) {
    %c0_i32 = arith.constant 0 : i32
    %c0_i32_0 = arith.constant 0 : i32
    return %c0_i32, %arg1 : i32, i32
  }
  func.func @transform_2(%arg0: i32, %arg1: i32) -> (i32, i32) {
    %c0_i32 = arith.constant 0 : i32
    %c0_i32_0 = arith.constant 0 : i32
    return %c0_i32, %arg1 : i32, i32
  }
  func.func @transform_3(%arg0: i32, %arg1: i32) -> (i32, i32) {
    %c0_i32 = arith.constant 0 : i32
    %c0_i32_0 = arith.constant 0 : i32
    return %arg1, %c0_i32 : i32, i32
  }
  func.func @transform_4(%arg0: i32, %arg1: i32) -> (i32, i32) {
    %c0_i32 = arith.constant 0 : i32
    %c0_i32_0 = arith.constant 0 : i32
    %c0_i32_1 = arith.constant 0 : i32
    return %c0_i32, %c0_i32_0 : i32, i32
  }
  func.func @transform_5(%arg0: i32, %arg1: i32) -> (i32, i32) {
    %c0_i32 = arith.constant 0 : i32
    %c0_i32_0 = arith.constant 0 : i32
    %c0_i32_1 = arith.constant 0 : i32
    return %c0_i32, %c0_i32_0 : i32, i32
  }
  func.func @transform_6(%arg0: i32, %arg1: i32) -> (i32, i32) {
    %c0_i32 = arith.constant 0 : i32
    %c0_i32_0 = arith.constant 0 : i32
    %c0_i32_1 = arith.constant 0 : i32
    return %c0_i32, %c0_i32_0 : i32, i32
  }
  func.func @transform_7(%arg0: i32, %arg1: i32) -> (i32, i32) {
    %c0_i32 = arith.constant 0 : i32
    %c0_i32_0 = arith.constant 0 : i32
    return %arg0, %c0_i32 : i32, i32
  }
}

module attributes {stable_mosaic.version = 11 : i64} {
  func.func @_mha_layer_kernel(%arg0: i32, %arg1: i32, %arg2: memref<1x8x32xbf16, #tpu.memory_space<vmem>>, %arg3: memref<1x32x8xbf16, #tpu.memory_space<vmem>>, %arg4: memref<1x32x8xbf16, #tpu.memory_space<vmem>>, %arg5: memref<1x32x8xbf16, #tpu.memory_space<vmem>>, %arg6: memref<1x1x8xf32, #tpu.memory_space<vmem>>, %arg7: memref<1x1x8xf32, #tpu.memory_space<vmem>>, %arg8: memref<1x1x8xf32, #tpu.memory_space<vmem>>, %arg9: memref<1x8x32xbf16, #tpu.memory_space<vmem>>, %arg10: memref<1x32xf32, #tpu.memory_space<vmem>>, %arg11: memref<1x32xf32, #tpu.memory_space<vmem>>, %arg12: memref<1x32xf32, #tpu.memory_space<vmem>>, %arg13: memref<1x8x32xbf16, #tpu.memory_space<vmem>>, %arg14: memref<8x32xf32, #tpu.memory_space<vmem>>) attributes {dimension_semantics = [#tpu.dimension_semantics<parallel>, #tpu.dimension_semantics<arbitrary>], iteration_bounds = array<i64: 2, 4>, scalar_prefetch = 0 : i64, scratch_operands = 1 : i64, tpu.core_type = #tpu.core_type<tc>, window_params = [{transform_indices = @transform_0, window_bounds = array<i64: 1, 8, 32>}, {transform_indices = @transform_1, window_bounds = array<i64: 1, 32, 8>}, {transform_indices = @transform_2, window_bounds = array<i64: 1, 32, 8>}, {transform_indices = @transform_3, window_bounds = array<i64: 1, 32, 8>}, {transform_indices = @transform_4, window_bounds = array<i64: 1, 1, 8>}, {transform_indices = @transform_5, window_bounds = array<i64: 1, 1, 8>}, {transform_indices = @transform_6, window_bounds = array<i64: 1, 1, 8>}, {transform_indices = @transform_7, window_bounds = array<i64: 1, 8, 32>}, {pipeline_mode = #tpu.pipeline_mode<synchronous>, transform_indices = @transform_8, window_bounds = array<i64: 1, 32>}, {pipeline_mode = #tpu.pipeline_mode<synchronous>, transform_indices = @transform_9, window_bounds = array<i64: 1, 32>}, {pipeline_mode = #tpu.pipeline_mode<synchronous>, transform_indices = @transform_10, window_bounds = array<i64: 1, 32>}, {transform_indices = @transform_11, window_bounds = array<i64: 1, 8, 32>}]} {
    %c0_i32 = arith.constant 0 : i32
    %0 = arith.cmpi eq, %arg1, %c0_i32 : i32
    %1 = arith.extui %0 : i1 to i32
    %c0_i32_0 = arith.constant 0 : i32
    %2 = arith.cmpi ne, %1, %c0_i32_0 : i32
    scf.if %2 {
      %cst_37 = arith.constant 0.000000e+00 : f32
      %54 = vector.broadcast %cst_37 : f32 to vector<8x32xf32>
      %c0_38 = arith.constant 0 : index
      %c0_39 = arith.constant 0 : index
      %55 = vector.load %arg14[%c0_38, %c0_39] : memref<8x32xf32, #tpu.memory_space<vmem>>, vector<8x32xf32>
      tpu.vector_store %arg14[%c0_38, %c0_39], %54 {strides = array<i32>} : memref<8x32xf32, #tpu.memory_space<vmem>>, vector<8x32xf32>,
    } else {
    }
    %c0 = arith.constant 0 : index
    %c0_1 = arith.constant 0 : index
    %c0_2 = arith.constant 0 : index
    %3 = vector.load %arg2[%c0, %c0_1, %c0_2] : memref<1x8x32xbf16, #tpu.memory_space<vmem>>, vector<1x8x32xbf16>
    %4 = vector.shape_cast %3 : vector<1x8x32xbf16> to vector<8x32xbf16>
    %c0_3 = arith.constant 0 : index
    %c0_4 = arith.constant 0 : index
    %c0_5 = arith.constant 0 : index
    %5 = vector.load %arg3[%c0_3, %c0_4, %c0_5] : memref<1x32x8xbf16, #tpu.memory_space<vmem>>, vector<1x32x8xbf16>
    %6 = vector.shape_cast %5 : vector<1x32x8xbf16> to vector<32x8xbf16>
    %cst = arith.constant dense<0.000000e+00> : vector<8x8xf32>
    %7 = tpu.matmul %4, %6, %cst {dimension_numbers = #tpu.dot_dimension_numbers<[1], [0], [0], [1], [0, 0, 1, 1], [], []>} : vector<8x32xbf16>, vector<32x8xbf16>, vector<8x8xf32> -> vector<8x8xf32>
    %c0_6 = arith.constant 0 : index
    %c0_7 = arith.constant 0 : index
    %c0_8 = arith.constant 0 : index
    %8 = vector.load %arg6[%c0_6, %c0_7, %c0_8] : memref<1x1x8xf32, #tpu.memory_space<vmem>>, vector<1x1x8xf32>
    %9 = vector.shape_cast %8 : vector<1x1x8xf32> to vector<1x8xf32>
    %10 = vector.broadcast %9 : vector<1x8xf32> to vector<8x8xf32>
    %11 = arith.addf %7, %10 : vector<8x8xf32>
    %c0_9 = arith.constant 0 : index
    %c0_10 = arith.constant 0 : index
    %c0_11 = arith.constant 0 : index
    %12 = vector.load %arg4[%c0_9, %c0_10, %c0_11] : memref<1x32x8xbf16, #tpu.memory_space<vmem>>, vector<1x32x8xbf16>
    %13 = vector.shape_cast %12 : vector<1x32x8xbf16> to vector<32x8xbf16>
    %cst_12 = arith.constant dense<0.000000e+00> : vector<8x8xf32>
    %14 = tpu.matmul %4, %13, %cst_12 {dimension_numbers = #tpu.dot_dimension_numbers<[1], [0], [0], [1], [0, 0, 1, 1], [], []>} : vector<8x32xbf16>, vector<32x8xbf16>, vector<8x8xf32> -> vector<8x8xf32>
    %c0_13 = arith.constant 0 : index
    %c0_14 = arith.constant 0 : index
    %c0_15 = arith.constant 0 : index
    %15 = vector.load %arg7[%c0_13, %c0_14, %c0_15] : memref<1x1x8xf32, #tpu.memory_space<vmem>>, vector<1x1x8xf32>
    %16 = vector.shape_cast %15 : vector<1x1x8xf32> to vector<1x8xf32>
    %17 = vector.broadcast %16 : vector<1x8xf32> to vector<8x8xf32>
    %18 = arith.addf %14, %17 : vector<8x8xf32>
    %c0_16 = arith.constant 0 : index
    %c0_17 = arith.constant 0 : index
    %c0_18 = arith.constant 0 : index
    %19 = vector.load %arg5[%c0_16, %c0_17, %c0_18] : memref<1x32x8xbf16, #tpu.memory_space<vmem>>, vector<1x32x8xbf16>
    %20 = vector.shape_cast %19 : vector<1x32x8xbf16> to vector<32x8xbf16>
    %cst_19 = arith.constant dense<0.000000e+00> : vector<8x8xf32>
    %21 = tpu.matmul %4, %20, %cst_19 {dimension_numbers = #tpu.dot_dimension_numbers<[1], [0], [0], [1], [0, 0, 1, 1], [], []>} : vector<8x32xbf16>, vector<32x8xbf16>, vector<8x8xf32> -> vector<8x8xf32>
    %c0_20 = arith.constant 0 : index
    %c0_21 = arith.constant 0 : index
    %c0_22 = arith.constant 0 : index
    %22 = vector.load %arg8[%c0_20, %c0_21, %c0_22] : memref<1x1x8xf32, #tpu.memory_space<vmem>>, vector<1x1x8xf32>
    %23 = vector.shape_cast %22 : vector<1x1x8xf32> to vector<1x8xf32>
    %24 = vector.broadcast %23 : vector<1x8xf32> to vector<8x8xf32>
    %25 = arith.addf %21, %24 : vector<8x8xf32>
    %cst_23 = arith.constant 0.353553385 : f32
    %26 = vector.broadcast %cst_23 : f32 to vector<8x8xf32>
    %27 = arith.mulf %11, %26 : vector<8x8xf32>
    %28 = arith.truncf %27 : vector<8x8xf32> to vector<8x8xbf16>
    %29 = arith.truncf %18 : vector<8x8xf32> to vector<8x8xbf16>
    %cst_24 = arith.constant dense<0.000000e+00> : vector<8x8xf32>
    %30 = tpu.matmul %28, %29, %cst_24 {dimension_numbers = #tpu.dot_dimension_numbers<[1], [1], [0], [0], [0, 0, 1, 0], [], []>} : vector<8x8xbf16>, vector<8x8xbf16>, vector<8x8xf32> -> vector<8x8xf32>
    %cst_25 = arith.constant dense<0xFF800000> : vector<8xf32>
    %31 = vector.multi_reduction <maximumf>, %30, %cst_25 [1] : vector<8x8xf32> to vector<8xf32>
    %32 = vector.shape_cast %31 : vector<8xf32> to vector<8x1xf32>
    %33 = vector.broadcast %32 : vector<8x1xf32> to vector<8x8xf32>
    %34 = arith.subf %30, %33 : vector<8x8xf32>
    %35 = math.exp %34 : vector<8x8xf32>
    %cst_26 = arith.constant dense<0.000000e+00> : vector<8xf32>
    %36 = vector.multi_reduction <add>, %35, %cst_26 [1] : vector<8x8xf32> to vector<8xf32>
    %37 = vector.shape_cast %36 : vector<8xf32> to vector<8x1xf32>
    %38 = tpu.reciprocal %37 {approx = true} : vector<8x1xf32> -> vector<8x1xf32>
    %39 = vector.broadcast %38 : vector<8x1xf32> to vector<8x8xf32>
    %40 = arith.mulf %35, %39 : vector<8x8xf32>
    %41 = arith.truncf %40 : vector<8x8xf32> to vector<8x8xbf16>
    %42 = arith.truncf %25 : vector<8x8xf32> to vector<8x8xbf16>
    %cst_27 = arith.constant dense<0.000000e+00> : vector<8x8xf32>
    %43 = tpu.matmul %41, %42, %cst_27 {dimension_numbers = #tpu.dot_dimension_numbers<[1], [0], [0], [1], [0, 0, 1, 1], [], []>} : vector<8x8xbf16>, vector<8x8xbf16>, vector<8x8xf32> -> vector<8x8xf32>
    %c0_28 = arith.constant 0 : index
    %c0_29 = arith.constant 0 : index
    %44 = vector.load %arg14[%c0_28, %c0_29] : memref<8x32xf32, #tpu.memory_space<vmem>>, vector<8x32xf32>
    %45 = arith.truncf %43 : vector<8x8xf32> to vector<8x8xbf16>
    %c0_30 = arith.constant 0 : index
    %c0_31 = arith.constant 0 : index
    %c0_32 = arith.constant 0 : index
    %46 = vector.load %arg9[%c0_30, %c0_31, %c0_32] : memref<1x8x32xbf16, #tpu.memory_space<vmem>>, vector<1x8x32xbf16>
    %47 = vector.shape_cast %46 : vector<1x8x32xbf16> to vector<8x32xbf16>
    %cst_33 = arith.constant dense<0.000000e+00> : vector<8x32xf32>
    %48 = tpu.matmul %45, %47, %cst_33 {dimension_numbers = #tpu.dot_dimension_numbers<[1], [0], [0], [1], [0, 0, 1, 1], [], []>} : vector<8x8xbf16>, vector<8x32xbf16>, vector<8x32xf32> -> vector<8x32xf32>
    %49 = arith.addf %44, %48 : vector<8x32xf32>
    %c0_34 = arith.constant 0 : index
    %c0_35 = arith.constant 0 : index
    %50 = vector.load %arg14[%c0_34, %c0_35] : memref<8x32xf32, #tpu.memory_space<vmem>>, vector<8x32xf32>
    tpu.vector_store %arg14[%c0_34, %c0_35], %49 {strides = array<i32>} : memref<8x32xf32, #tpu.memory_space<vmem>>, vector<8x32xf32>,
    %c3_i32 = arith.constant 3 : i32
    %51 = arith.cmpi eq, %arg1, %c3_i32 : i32
    %52 = arith.extui %51 : i1 to i32
    %c0_i32_36 = arith.constant 0 : i32
    %53 = arith.cmpi ne, %52, %c0_i32_36 : i32
    scf.if %53 {
      %c0_37 = arith.constant 0 : index
      %c0_38 = arith.constant 0 : index
      %54 = vector.load %arg14[%c0_37, %c0_38] : memref<8x32xf32, #tpu.memory_space<vmem>>, vector<8x32xf32>
      %c0_39 = arith.constant 0 : index
      %c0_40 = arith.constant 0 : index
      %55 = vector.load %arg10[%c0_39, %c0_40] : memref<1x32xf32, #tpu.memory_space<vmem>>, vector<1x32xf32>
      %56 = vector.broadcast %55 : vector<1x32xf32> to vector<8x32xf32>
      %57 = arith.addf %54, %56 : vector<8x32xf32>
      %58 = arith.extf %4 : vector<8x32xbf16> to vector<8x32xf32>
      %59 = arith.addf %57, %58 : vector<8x32xf32>
      %cst_41 = arith.constant dense<0.000000e+00> : vector<8xf32>
      %60 = vector.multi_reduction <add>, %59, %cst_41 [1] : vector<8x32xf32> to vector<8xf32>
      %61 = vector.shape_cast %60 : vector<8xf32> to vector<8x1xf32>
      %cst_42 = arith.constant 3.200000e+01 : f32
      %62 = vector.broadcast %cst_42 : f32 to vector<8x1xf32>
      %63 = arith.divf %61, %62 : vector<8x1xf32>
      %64 = vector.broadcast %63 : vector<8x1xf32> to vector<8x32xf32>
      %65 = arith.subf %59, %64 : vector<8x32xf32>
      %66 = arith.mulf %65, %65 : vector<8x32xf32>
      %cst_43 = arith.constant dense<0.000000e+00> : vector<8xf32>
      %67 = vector.multi_reduction <add>, %66, %cst_43 [1] : vector<8x32xf32> to vector<8xf32>
      %68 = vector.shape_cast %67 : vector<8xf32> to vector<8x1xf32>
      %cst_44 = arith.constant 3.200000e+01 : f32
      %69 = vector.broadcast %cst_44 : f32 to vector<8x1xf32>
      %70 = arith.divf %68, %69 : vector<8x1xf32>
      %71 = vector.broadcast %63 : vector<8x1xf32> to vector<8x32xf32>
      %72 = arith.subf %59, %71 : vector<8x32xf32>
      %cst_45 = arith.constant 9.99999974E-6 : f32
      %73 = vector.broadcast %cst_45 : f32 to vector<8x1xf32>
      %74 = arith.addf %70, %73 : vector<8x1xf32>
      %75 = math.rsqrt %74 : vector<8x1xf32>
      %76 = vector.broadcast %75 : vector<8x1xf32> to vector<8x32xf32>
      %77 = arith.mulf %72, %76 : vector<8x32xf32>
      %c0_46 = arith.constant 0 : index
      %c0_47 = arith.constant 0 : index
      %78 = vector.load %arg11[%c0_46, %c0_47] : memref<1x32xf32, #tpu.memory_space<vmem>>, vector<1x32xf32>
      %79 = vector.broadcast %78 : vector<1x32xf32> to vector<8x32xf32>
      %80 = arith.mulf %77, %79 : vector<8x32xf32>
      %c0_48 = arith.constant 0 : index
      %c0_49 = arith.constant 0 : index
      %81 = vector.load %arg12[%c0_48, %c0_49] : memref<1x32xf32, #tpu.memory_space<vmem>>, vector<1x32xf32>
      %82 = vector.broadcast %81 : vector<1x32xf32> to vector<8x32xf32>
      %83 = arith.addf %80, %82 : vector<8x32xf32>
      %84 = arith.truncf %83 : vector<8x32xf32> to vector<8x32xbf16>
      %c0_50 = arith.constant 0 : index
      %c0_51 = arith.constant 0 : index
      %c0_52 = arith.constant 0 : index
      %85 = vector.load %arg13[%c0_50, %c0_51, %c0_52] : memref<1x8x32xbf16, #tpu.memory_space<vmem>>, vector<1x8x32xbf16>
      %86 = vector.shape_cast %85 : vector<1x8x32xbf16> to vector<8x32xbf16>
      %87 = vector.shape_cast %84 : vector<8x32xbf16> to vector<1x8x32xbf16>
      tpu.vector_store %arg13[%c0_50, %c0_51, %c0_52], %87 {strides = array<i32>} : memref<1x8x32xbf16, #tpu.memory_space<vmem>>, vector<1x8x32xbf16>,
    } else {
    }
    return
  }
  func.func @transform_0(%arg0: i32, %arg1: i32) -> (i32, i32, i32) {
    %c0_i32 = arith.constant 0 : i32
    %c0_i32_0 = arith.constant 0 : i32
    %c0_i32_1 = arith.constant 0 : i32
    return %arg0, %c0_i32, %c0_i32_0 : i32, i32, i32
  }
  func.func @transform_1(%arg0: i32, %arg1: i32) -> (i32, i32, i32) {
    %c0_i32 = arith.constant 0 : i32
    %c0_i32_0 = arith.constant 0 : i32
    %c0_i32_1 = arith.constant 0 : i32
    return %arg1, %c0_i32, %c0_i32_0 : i32, i32, i32
  }
  func.func @transform_2(%arg0: i32, %arg1: i32) -> (i32, i32, i32) {
    %c0_i32 = arith.constant 0 : i32
    %c0_i32_0 = arith.constant 0 : i32
    %c0_i32_1 = arith.constant 0 : i32
    return %arg1, %c0_i32, %c0_i32_0 : i32, i32, i32
  }
  func.func @transform_3(%arg0: i32, %arg1: i32) -> (i32, i32, i32) {
    %c0_i32 = arith.constant 0 : i32
    %c0_i32_0 = arith.constant 0 : i32
    %c0_i32_1 = arith.constant 0 : i32
    return %arg1, %c0_i32, %c0_i32_0 : i32, i32, i32
  }
  func.func @transform_4(%arg0: i32, %arg1: i32) -> (i32, i32, i32) {
    %c0_i32 = arith.constant 0 : i32
    %c0_i32_0 = arith.constant 0 : i32
    %c0_i32_1 = arith.constant 0 : i32
    return %arg1, %c0_i32, %c0_i32_0 : i32, i32, i32
  }
  func.func @transform_5(%arg0: i32, %arg1: i32) -> (i32, i32, i32) {
    %c0_i32 = arith.constant 0 : i32
    %c0_i32_0 = arith.constant 0 : i32
    %c0_i32_1 = arith.constant 0 : i32
    return %arg1, %c0_i32, %c0_i32_0 : i32, i32, i32
  }
  func.func @transform_6(%arg0: i32, %arg1: i32) -> (i32, i32, i32) {
    %c0_i32 = arith.constant 0 : i32
    %c0_i32_0 = arith.constant 0 : i32
    %c0_i32_1 = arith.constant 0 : i32
    return %arg1, %c0_i32, %c0_i32_0 : i32, i32, i32
  }
  func.func @transform_7(%arg0: i32, %arg1: i32) -> (i32, i32, i32) {
    %c0_i32 = arith.constant 0 : i32
    %c0_i32_0 = arith.constant 0 : i32
    %c0_i32_1 = arith.constant 0 : i32
    return %arg1, %c0_i32, %c0_i32_0 : i32, i32, i32
  }
  func.func @transform_8(%arg0: i32, %arg1: i32) -> (i32, i32) {
    %c0_i32 = arith.constant 0 : i32
    %c0_i32_0 = arith.constant 0 : i32
    %c0_i32_1 = arith.constant 0 : i32
    return %c0_i32, %c0_i32_0 : i32, i32
  }
  func.func @transform_9(%arg0: i32, %arg1: i32) -> (i32, i32) {
    %c0_i32 = arith.constant 0 : i32
    %c0_i32_0 = arith.constant 0 : i32
    %c0_i32_1 = arith.constant 0 : i32
    return %c0_i32, %c0_i32_0 : i32, i32
  }
  func.func @transform_10(%arg0: i32, %arg1: i32) -> (i32, i32) {
    %c0_i32 = arith.constant 0 : i32
    %c0_i32_0 = arith.constant 0 : i32
    %c0_i32_1 = arith.constant 0 : i32
    return %c0_i32, %c0_i32_0 : i32, i32
  }
  func.func @transform_11(%arg0: i32, %arg1: i32) -> (i32, i32, i32) {
    %c0_i32 = arith.constant 0 : i32
    %c0_i32_0 = arith.constant 0 : i32
    %c0_i32_1 = arith.constant 0 : i32
    return %arg0, %c0_i32, %c0_i32_0 : i32, i32, i32
  }
}

module attributes {stable_mosaic.version = 11 : i64} {
  func.func @_linear_acc_kernel(%arg0: i32, %arg1: i32, %arg2: i32, %arg3: memref<2x256xbf16, #tpu.memory_space<vmem>>, %arg4: memref<256x128xbf16, #tpu.memory_space<vmem>>, %arg5: memref<1x128xf32, #tpu.memory_space<vmem>>, %arg6: memref<2x128xf32, #tpu.memory_space<vmem>>, %arg7: memref<2x128xf32, #tpu.memory_space<vmem>>) attributes {dimension_semantics = [#tpu.dimension_semantics<parallel>, #tpu.dimension_semantics<parallel>, #tpu.dimension_semantics<arbitrary>], iteration_bounds = array<i64: 1, 1, 1>, scalar_prefetch = 0 : i64, scratch_operands = 1 : i64, tpu.core_type = #tpu.core_type<tc>, window_params = [{transform_indices = @transform_0, window_bounds = array<i64: 2, 256>}, {transform_indices = @transform_1, window_bounds = array<i64: 256, 128>}, {transform_indices = @transform_2, window_bounds = array<i64: 1, 128>}, {transform_indices = @transform_3, window_bounds = array<i64: 2, 128>}]} {
    %c0_i32 = arith.constant 0 : i32
    %0 = arith.cmpi eq, %arg2, %c0_i32 : i32
    %1 = arith.extui %0 : i1 to i32
    %c0_i32_0 = arith.constant 0 : i32
    %2 = arith.cmpi ne, %1, %c0_i32_0 : i32
    scf.if %2 {
      %cst_10 = arith.constant 0.000000e+00 : f32
      %12 = vector.broadcast %cst_10 : f32 to vector<2x128xf32>
      %c0_11 = arith.constant 0 : index
      %c0_12 = arith.constant 0 : index
      %13 = vector.load %arg7[%c0_11, %c0_12] : memref<2x128xf32, #tpu.memory_space<vmem>>, vector<2x128xf32>
      tpu.vector_store %arg7[%c0_11, %c0_12], %12 {strides = array<i32>} : memref<2x128xf32, #tpu.memory_space<vmem>>, vector<2x128xf32>,
    } else {
    }
    %c0 = arith.constant 0 : index
    %c0_1 = arith.constant 0 : index
    %3 = vector.load %arg7[%c0, %c0_1] : memref<2x128xf32, #tpu.memory_space<vmem>>, vector<2x128xf32>
    %c0_2 = arith.constant 0 : index
    %c0_3 = arith.constant 0 : index
    %4 = vector.load %arg3[%c0_2, %c0_3] : memref<2x256xbf16, #tpu.memory_space<vmem>>, vector<2x256xbf16>
    %c0_4 = arith.constant 0 : index
    %c0_5 = arith.constant 0 : index
    %5 = vector.load %arg4[%c0_4, %c0_5] : memref<256x128xbf16, #tpu.memory_space<vmem>>, vector<256x128xbf16>
    %cst = arith.constant dense<0.000000e+00> : vector<2x128xf32>
    %6 = tpu.matmul %4, %5, %cst {dimension_numbers = #tpu.dot_dimension_numbers<[1], [0], [0], [1], [0, 0, 1, 1], [], []>} : vector<2x256xbf16>, vector<256x128xbf16>, vector<2x128xf32> -> vector<2x128xf32>
    %7 = arith.addf %3, %6 : vector<2x128xf32>
    %c0_6 = arith.constant 0 : index
    %c0_7 = arith.constant 0 : index
    %8 = vector.load %arg7[%c0_6, %c0_7] : memref<2x128xf32, #tpu.memory_space<vmem>>, vector<2x128xf32>
    tpu.vector_store %arg7[%c0_6, %c0_7], %7 {strides = array<i32>} : memref<2x128xf32, #tpu.memory_space<vmem>>, vector<2x128xf32>,
    %c0_i32_8 = arith.constant 0 : i32
    %9 = arith.cmpi eq, %arg2, %c0_i32_8 : i32
    %10 = arith.extui %9 : i1 to i32
    %c0_i32_9 = arith.constant 0 : i32
    %11 = arith.cmpi ne, %10, %c0_i32_9 : i32
    scf.if %11 {
      %c0_10 = arith.constant 0 : index
      %c0_11 = arith.constant 0 : index
      %12 = vector.load %arg7[%c0_10, %c0_11] : memref<2x128xf32, #tpu.memory_space<vmem>>, vector<2x128xf32>
      %c0_12 = arith.constant 0 : index
      %c0_13 = arith.constant 0 : index
      %13 = vector.load %arg5[%c0_12, %c0_13] : memref<1x128xf32, #tpu.memory_space<vmem>>, vector<1x128xf32>
      %14 = vector.broadcast %13 : vector<1x128xf32> to vector<2x128xf32>
      %15 = arith.addf %12, %14 : vector<2x128xf32>
      %c0_14 = arith.constant 0 : index
      %c0_15 = arith.constant 0 : index
      %16 = vector.load %arg6[%c0_14, %c0_15] : memref<2x128xf32, #tpu.memory_space<vmem>>, vector<2x128xf32>
      tpu.vector_store %arg6[%c0_14, %c0_15], %15 {strides = array<i32>} : memref<2x128xf32, #tpu.memory_space<vmem>>, vector<2x128xf32>,
    } else {
    }
    return
  }
  func.func @transform_0(%arg0: i32, %arg1: i32, %arg2: i32) -> (i32, i32) {
    %c0_i32 = arith.constant 0 : i32
    return %arg0, %arg2 : i32, i32
  }
  func.func @transform_1(%arg0: i32, %arg1: i32, %arg2: i32) -> (i32, i32) {
    %c0_i32 = arith.constant 0 : i32
    return %arg2, %arg1 : i32, i32
  }
  func.func @transform_2(%arg0: i32, %arg1: i32, %arg2: i32) -> (i32, i32) {
    %c0_i32 = arith.constant 0 : i32
    %c0_i32_0 = arith.constant 0 : i32
    return %c0_i32, %arg1 : i32, i32
  }
  func.func @transform_3(%arg0: i32, %arg1: i32, %arg2: i32) -> (i32, i32) {
    %c0_i32 = arith.constant 0 : i32
    return %arg0, %arg1 : i32, i32
  }
}

module attributes {stable_mosaic.version = 11 : i64} {
  func.func @_layernorm_kernel(%arg0: i32, %arg1: memref<16x32xbf16, #tpu.memory_space<vmem>>, %arg2: memref<1x32xf32, #tpu.memory_space<vmem>>, %arg3: memref<1x32xf32, #tpu.memory_space<vmem>>, %arg4: memref<16x32xbf16, #tpu.memory_space<vmem>>) attributes {dimension_semantics = [#tpu.dimension_semantics<parallel>], iteration_bounds = array<i64: 1>, scalar_prefetch = 0 : i64, scratch_operands = 0 : i64, tpu.core_type = #tpu.core_type<tc>, window_params = [{transform_indices = @transform_0, window_bounds = array<i64: 16, 32>}, {pipeline_mode = #tpu.pipeline_mode<synchronous>, transform_indices = @transform_1, window_bounds = array<i64: 1, 32>}, {pipeline_mode = #tpu.pipeline_mode<synchronous>, transform_indices = @transform_2, window_bounds = array<i64: 1, 32>}, {transform_indices = @transform_3, window_bounds = array<i64: 16, 32>}]} {
    %c0 = arith.constant 0 : index
    %c0_0 = arith.constant 0 : index
    %0 = vector.load %arg1[%c0, %c0_0] : memref<16x32xbf16, #tpu.memory_space<vmem>>, vector<16x32xbf16>
    %1 = arith.extf %0 : vector<16x32xbf16> to vector<16x32xf32>
    %cst = arith.constant dense<0.000000e+00> : vector<16xf32>
    %2 = vector.multi_reduction <add>, %1, %cst [1] : vector<16x32xf32> to vector<16xf32>
    %3 = vector.shape_cast %2 : vector<16xf32> to vector<16x1xf32>
    %cst_1 = arith.constant 3.200000e+01 : f32
    %4 = vector.broadcast %cst_1 : f32 to vector<16x1xf32>
    %5 = arith.divf %3, %4 : vector<16x1xf32>
    %6 = vector.broadcast %5 : vector<16x1xf32> to vector<16x32xf32>
    %7 = arith.subf %1, %6 : vector<16x32xf32>
    %8 = arith.mulf %7, %7 : vector<16x32xf32>
    %cst_2 = arith.constant dense<0.000000e+00> : vector<16xf32>
    %9 = vector.multi_reduction <add>, %8, %cst_2 [1] : vector<16x32xf32> to vector<16xf32>
    %10 = vector.shape_cast %9 : vector<16xf32> to vector<16x1xf32>
    %cst_3 = arith.constant 3.200000e+01 : f32
    %11 = vector.broadcast %cst_3 : f32 to vector<16x1xf32>
    %12 = arith.divf %10, %11 : vector<16x1xf32>
    %13 = vector.broadcast %5 : vector<16x1xf32> to vector<16x32xf32>
    %14 = arith.subf %1, %13 : vector<16x32xf32>
    %cst_4 = arith.constant 9.99999974E-6 : f32
    %15 = vector.broadcast %cst_4 : f32 to vector<16x1xf32>
    %16 = arith.addf %12, %15 : vector<16x1xf32>
    %17 = math.rsqrt %16 : vector<16x1xf32>
    %18 = vector.broadcast %17 : vector<16x1xf32> to vector<16x32xf32>
    %19 = arith.mulf %14, %18 : vector<16x32xf32>
    %c0_5 = arith.constant 0 : index
    %c0_6 = arith.constant 0 : index
    %20 = vector.load %arg2[%c0_5, %c0_6] : memref<1x32xf32, #tpu.memory_space<vmem>>, vector<1x32xf32>
    %21 = vector.broadcast %20 : vector<1x32xf32> to vector<16x32xf32>
    %22 = arith.mulf %19, %21 : vector<16x32xf32>
    %c0_7 = arith.constant 0 : index
    %c0_8 = arith.constant 0 : index
    %23 = vector.load %arg3[%c0_7, %c0_8] : memref<1x32xf32, #tpu.memory_space<vmem>>, vector<1x32xf32>
    %24 = vector.broadcast %23 : vector<1x32xf32> to vector<16x32xf32>
    %25 = arith.addf %22, %24 : vector<16x32xf32>
    %26 = arith.truncf %25 : vector<16x32xf32> to vector<16x32xbf16>
    %c0_9 = arith.constant 0 : index
    %c0_10 = arith.constant 0 : index
    %27 = vector.load %arg4[%c0_9, %c0_10] : memref<16x32xbf16, #tpu.memory_space<vmem>>, vector<16x32xbf16>
    tpu.vector_store %arg4[%c0_9, %c0_10], %26 {strides = array<i32>} : memref<16x32xbf16, #tpu.memory_space<vmem>>, vector<16x32xbf16>,
    return
  }
  func.func @transform_0(%arg0: i32) -> (i32, i32) {
    %c0_i32 = arith.constant 0 : i32
    %c0_i32_0 = arith.constant 0 : i32
    return %arg0, %c0_i32 : i32, i32
  }
  func.func @transform_1(%arg0: i32) -> (i32, i32) {
    %c0_i32 = arith.constant 0 : i32
    %c0_i32_0 = arith.constant 0 : i32
    %c0_i32_1 = arith.constant 0 : i32
    return %c0_i32, %c0_i32_0 : i32, i32
  }
  func.func @transform_2(%arg0: i32) -> (i32, i32) {
    %c0_i32 = arith.constant 0 : i32
    %c0_i32_0 = arith.constant 0 : i32
    %c0_i32_1 = arith.constant 0 : i32
    return %c0_i32, %c0_i32_0 : i32, i32
  }
  func.func @transform_3(%arg0: i32) -> (i32, i32) {
    %c0_i32 = arith.constant 0 : i32
    %c0_i32_0 = arith.constant 0 : i32
    return %arg0, %c0_i32 : i32, i32
  }
}

</mosaic_0001>

<bundles_post_ra>
// kernel: transformer_classifier_forward.7
= control target key start
LH: loop header
LB: loop body
LE: loop exit
PB: predicated region body
PF: predicated region fallthrough
CT: control target
= control target key end

     0   :  { %9 = vsyncpa [#allocation3], 0  ;;  %s738_s0 = inlined_call_operand.hbm [shape: f32[2,8,16], index: 0, kind: input, shape index: {}]   ;;  %s739_s1 = inlined_call_operand.vmem [shape: bf16[16,32], index: 1, kind: input, shape index: {}]   ;;  %s740_s2 = inlined_call_operand.vmem [shape: f32[1,32], index: 2, kind: input, shape index: {}]   ;;  %s741_s3 = inlined_call_operand.hbm [shape: f32[8,32], index: 3, kind: input, shape index: {}]   ;;  %s742_s4 = inlined_call_operand.vmem [shape: bf16[2,8,32], index: 4, kind: output, shape index: {}]  }
   0x1   :  { %11 = vsyncpa [#allocation3 + $0x1], 0 }
   0x2   :  { %12 = vsyncpa [#allocation5], 0  ;;  %s621_s15 = smov 0   ;;  %s623_s16 = smov 0  }
   0x3   :  { %s625_s17 = smov 0   ;;  %s627_s18 = smov 0  }
   0x4   :  { %s629_s19 = smov 0   ;;  %s631_s20 = smov 0  }
   0x5 LB: > { %s393_s21 = sadd.s32 4294967295, %s593_s20   ;;  %p52_p0 = scmp.ne.s32.totalorder %s577_s16, %s573_s15  ;;  %s593_s20 = sphi %s631_s20, %s18_s20   ;;  %s589_s19 = sphi %s629_s19, %s751_s19   ;;  %s585_s18 = sphi %s627_s18, %s750_s18   ;;  %s581_s17 = sphi %s625_s17, %s749_s17   ;;  %s577_s16 = sphi %s623_s16, %s748_s16   ;;  %s573_s15 = sphi %s621_s15, %s747_s15  }
   0x6   : > { %p651_p1 = scmp.eq.s32.totalorder %s393_s21, 0  ;;  %p395_p2 = scmp.ge.s32.totalorder %s593_s20, 1 }
   0x7   : > { %p159_p3 = scmp.lt.s32.totalorder %s593_s20, 3  ;;  %s179_s26 = sshll.u32 %s741_s3, 4  ;;  %s180_s26 = int_to_ptr.hbm [resolvable:$true] %s179_s26 }
   0x8   : > { %p659_p4 = por %p651_p1, %p52_p0  ;;  %s595_s28 = smov [#allocation4]  }
   0x9   : > { %p666_p5 = pnand %p395_p2, %p159_p3  ;;  %s181_s29 = sshll.u32 %s595_s28, 4  ;;  %s182_s29 = int_to_ptr.vmem [resolvable:$true] %s181_s29 }
   0xa   : > { %s30_s30 = sadd.s32 1, %s589_s19  ;;  %p46_p9 = scmp.ne.s32.totalorder %s581_s17, %s577_s16 }
   0xb   : > { %p418_p6 = pneg %p666_p5  ;;  %p32_p8 = scmp.ge.s32.totalorder %s30_s30, 2 }
   0xc   : > { %p47_p10 = scmp.eq.s32.totalorder %s593_s20, 0  ;;  %s39_s5 = sadd.s32 1, %s581_s17 }
   0xd   : > { %p419_p7 = pnand %p418_p6, %p651_p1  ;;  %s753_s30 = smov (%p32_p8, %s30_s30), 0 }
   0xe   : > { %p681_p11 = por %p47_p10, %p46_p9  ;;  %s34_s7 = ssub.s32 %s589_s19, %s753_s30 }
   0xf   : > { %421 = dma.hbm_to_vmem [thread:$0]  (!%p419_p7), %s180_s26, 128, %s182_s29, [#allocation5]  }
  0x10   : > { %s192_s8 = sand.u32 1, %s581_s17   ;;  %p37_p12 = scmp.eq.s32.totalorder %s34_s7, 0 }
  0x11   : > { %p427_p13 = scmp.lt.s32.totalorder %s593_s20, 2  ;;  %s398_s9 = sshll.u32 %s192_s8, 3 }
  0x12   : > { %s399_s10 = sshll.u32 %s589_s19, 3  ;;  %s196_s21 = scalar_lea.vmem [#allocation2], %s398_s9 }
  0x13   : > { %s691_s11 = scalar_select %p37_p12, %s581_s17, %s39_s5  }
  0x14   : > { %s201_s14 = scalar_lea.hbm %s738_s0, %s399_s10  ;;  %s205_s24 = sshll.u32 %s196_s21, 4  ;;  %s206_s24 = int_to_ptr.vmem [resolvable:$true] %s205_s24 }
  0x15   : > { %s203_s15 = sshll.u32 %s201_s14, 4  ;;  %p423_p0 = pnand %p427_p13, %p681_p11  ;;  %s204_s15 = int_to_ptr.hbm [resolvable:$true] %s203_s15 }
  0x16   : > { %s193_s25 = scalar_lea.sflag [#allocation3], %s192_s8  ;;  %214 = sbr.rel (%p666_p5) target bundleno = 168 (0xa8), region = 36 }
  0x17   : > { %425 = dma.hbm_to_vmem [thread:$0]  (!%p423_p0), %s204_s15, 128, %s206_s24, %s193_s25  }
  0x18   : > { %s216_s26 = sand.u32 (!%p666_p5), 1, %s577_s16  }
  0x19   : > { %s401_s28 = sshll.u32 (!%p666_p5), %s216_s26, 3  ;;  %s217_s29 = scalar_lea.sflag (!%p666_p5), [#allocation3], %s216_s26 }
  0x1a   : > { %s220_s5 = scalar_lea.vmem (!%p666_p5), [#allocation2], %s401_s28 }
  0x1b   : > { %564 = dma.done.wait (%p659_p4), %s217_s29, 128  }
  0x1c   : > { %566 = vsyncadd (%p659_p4), %s217_s29, 4294967168 }
  0x1d   : > { %568 = dma.done.wait (%p651_p1), [#allocation5], 128  }
  0x1e   : > { %570 = vsyncadd (%p651_p1), [#allocation5], 4294967168  ;;  %v411_v0 = vld [vmem:[%s739_s1] sm:$0xff]  ;;  %vm275_vm0 = vcmask 130048   ;;  %p253_p2 = scmp.lt.s32.totalorder %s585_s18, 1  ;;  %v292_v5 = vld [vmem:[#allocation4] sm:$0xff] }
  0x1f   : > { %v261_v1 = vld [vmem:[%s220_s5] sm:$0xff]  ;;  %286 = vmatpush.bf16.msra.mxu0 %v411_v0  ;;  %vm295_vm1 = vcmask 257024  }
  0x20   : > { %v262_v2 = vpack.c.bf16 %v261_v1, %v261_v1  ;;  %s755_s18 = smov (!%p253_p2, %s585_s18), 1  ;;  %v478_v3 = vld [vmem:[%s740_s2] ss:$0 sm:$0xff] }
  0x21   : > { %s403_s22 = sshll.u32 %s755_s18, 2 }
  0x22   : > { %408 = vmatmul.msk.bf16.vlgmr.msra.gmra.mxu0 %vm275_vm0, %v262_v2  ;;  %s259_s10 = scalar_lea.vmem %s742_s4, %s403_s22 }
  0x9f   : > { %v288_v4 = vpop.f32.mrf.mxu0 }
  0xa0   : > { %v289_v6 = vadd.f32 %v478_v3, %v288_v4 }
  0xa2   : > { %v293_v7 = vadd.f32 %v292_v5, %v289_v6 }
  0xa4   : > { %v294_v8 = vpack.c.bf16 %v293_v7, %v293_v7 }
  0xa6   : > { %296 = vst.msk [vmem:[%s259_s10] sm:$0xf] %vm295_vm1, %v294_v8 }
  0xa7   : > { %v290_v9 = vpop.f32.mrf.mxu0 }
  0xa8 PF: > { %s18_s20 = sadd.s32 1, %s593_s20   ;;  %s747_s15 = smov %s577_s16 }
  0xa9   : > { %p15_p1 = scmp.ge.s32.totalorder %s18_s20, 4   ;;  %s748_s16 = smov %s581_s17 }
  0xaa   : > { %s749_s17 = smov %s691_s11  ;;  %s750_s18 = smov %s589_s19 }
  0xab   : > { %s751_s19 = smov %s753_s30  ;;  %17 = sbr.rel (!%p15_p1) target bundleno = 5 (0x5), region = 81 }
  0xb0   :  { %322 = vsyncpa [#allocation3], 1 }
  0xb1   :  { %324 = vsyncpa [#allocation3 + $0x1], 1 }
  0xb2   :  { %325 = vsyncpa [#allocation5], 1 }

// kernel: transformer_classifier_forward.8
= control target key start
LH: loop header
LB: loop body
LE: loop exit
PB: predicated region body
PF: predicated region fallthrough
CT: control target
= control target key end

     0   :  { %s1896_s0 = inlined_call_operand.vmem [shape: bf16[2,8,32], index: 0, kind: input, shape index: {}]   ;;  %s1897_s1 = inlined_call_operand.vmem [shape: bf16[4,32,8], index: 1, kind: input, shape index: {}]   ;;  %s1898_s2 = inlined_call_operand.vmem [shape: bf16[4,32,8], index: 2, kind: input, shape index: {}]   ;;  %s1899_s3 = inlined_call_operand.vmem [shape: bf16[4,32,8], index: 3, kind: input, shape index: {}]   ;;  %s1900_s4 = inlined_call_operand.hbm [shape: f32[4,1,8], index: 4, kind: input, shape index: {}]   ;;  %s1901_s5 = inlined_call_operand.hbm [shape: f32[4,1,8], index: 5, kind: input, shape index: {}]   ;;  %s1902_s6 = inlined_call_operand.hbm [shape: f32[4,1,8], index: 6, kind: input, shape index: {}]   ;;  %s1903_s7 = inlined_call_operand.hbm [shape: bf16[4,8,32], index: 7, kind: input, shape index: {}]   ;;  %s1904_s8 = inlined_call_operand.hbm [shape: f32[1,32], index: 8, kind: input, shape index: {}]   ;;  %s1905_s9 = inlined_call_operand.hbm [shape: f32[1,32], index: 9, kind: input, shape index: {}]   ;;  %s1906_s10 = inlined_call_operand.hbm [shape: f32[1,32], index: 10, kind: input, shape index: {}]   ;;  %s1907_s11 = inlined_call_operand.vmem [shape: bf16[2,8,32], index: 11, kind: output, shape index: {}]  }
   0x1   :  { %1913 = sst [smem:[#allocation24_spill]] %s1900_s4 }
   0x2   :  { %1914 = sst [smem:[#allocation25_spill]] %s1901_s5 }
   0x3   :  { %1915 = sst [smem:[#allocation26_spill]] %s1904_s8 }
   0x4   :  { %1916 = sst [smem:[#allocation27_spill]] %s1905_s9 }
   0x5   :  { %1917 = sst [smem:[#allocation28_spill]] %s1906_s10 }
   0x6   :  { %1918 = sst [smem:[#allocation29_spill]] %s1907_s11 }
   0x7   :  { %16 = vsyncpa [#allocation4], 0 }
   0x8   :  { %18 = vsyncpa [#allocation4 + $0x1], 0 }
   0x9   :  { %19 = vsyncpa [#allocation6], 0 }
   0xa   :  { %21 = vsyncpa [#allocation6 + $0x1], 0 }
   0xb   :  { %22 = vsyncpa [#allocation9], 0 }
   0xc   :  { %24 = vsyncpa [#allocation9 + $0x1], 0 }
   0xd   :  { %25 = vsyncpa [#allocation12], 0  ;;  %s1646_s17 = smov 0   ;;  %s1648_s18 = smov 0  }
   0xe   :  { %s1650_s19 = smov 0   ;;  %s1652_s20 = smov 0  }
   0xf   :  { %s1654_s21 = smov 0   ;;  %s1656_s22 = smov 0  }
  0x10   :  { %s1658_s23 = smov 0   ;;  %s1660_s24 = smov 0  }
  0x11 LB: > { %1919 = sst [smem:[#allocation19_spill]] %s1559_s19  ;;  %s1908_s25 = sadd.s32 4294967295, %s1579_s24   ;;  %s1579_s24 = sphi %s1660_s24, %s31_s24   ;;  %s1575_s23 = sphi %s1658_s23, %s1944_s23   ;;  %s1571_s22 = sphi %s1656_s22, %s1948_s22   ;;  %s1567_s21 = sphi %s1654_s21, %s1942_s21   ;;  %s1563_s20 = sphi %s1652_s20, %s1947_s20   ;;  %s1559_s19 = sphi %s1650_s19, %s1941_s19   ;;  %s1555_s18 = sphi %s1648_s18, %s1946_s18   ;;  %s1551_s17 = sphi %s1646_s17, %s1945_s17  }
  0x12   : > { %1920 = sst [smem:[#allocation20_spill]] %s1575_s23  ;;  %p167_p0 = scmp.ne.s32.totalorder %s1555_s18, %s1551_s17 }
  0x13   : > { %p1688_p1 = scmp.eq.s32.totalorder %s1908_s25, 0  ;;  %p1091_p2 = scmp.ge.s32.totalorder %s1579_s24, 1 }
  0x14   : > { %p345_p3 = scmp.lt.s32.totalorder %s1579_s24, 9  ;;  %s1923_s8 = sld [smem:[#allocation26_spill]] }
  0x15   : > { %p1696_p4 = por %p1688_p1, %p167_p0  ;;  %s1581_s13 = smov [#allocation10]  }
  0x16   : > { %p1703_p5 = pnand %p1091_p2, %p345_p3  ;;  %s359_s14 = sshll.u32 %s1581_s13, 4  ;;  %s360_s14 = int_to_ptr.vmem [resolvable:$true] %s359_s14 }
  0x17   : > { %s1925_s9 = sld [smem:[#allocation27_spill]]  ;;  %s1582_s29 = smov [#allocation11]  }
  0x18   : > { %p1174_p6 = pneg %p1703_p5  ;;  %s371_s25 = sshll.u32 %s1582_s29, 4  ;;  %s372_s25 = int_to_ptr.vmem [resolvable:$true] %s371_s25 }
  0x19   : > { %s40_s13 = sadd.s32 1, %s1571_s22  ;;  %s43_s15 = sadd.s32 1, %s1575_s23 }
  0x1a   : > { %s357_s30 = sshll.u32 %s1923_s8, 4  ;;  %p1714_p7 = pnand %p1174_p6, %p1688_p1  ;;  %s358_s30 = int_to_ptr.hbm [resolvable:$true] %s357_s30 }
  0x1b   : > { %p41_p8 = scmp.ge.s32.totalorder %s40_s13, 4  ;;  %s154_s16 = sadd.s32 1, %s1559_s19 }
  0x1c   : > { %1177 = dma.hbm_to_vmem [thread:$0]  (!%p1714_p7), %s358_s30, 16, %s360_s14, [#allocation9]  }
  0x1d   : > { %s369_s17 = sshll.u32 %s1925_s9, 4  ;;  %p161_p9 = scmp.ne.s32.totalorder %s1559_s19, %s1555_s18  ;;  %s370_s17 = int_to_ptr.hbm [resolvable:$true] %s369_s17 }
  0x1e   : > { %1180 = dma.hbm_to_vmem [thread:$0]  (!%p1714_p7), %s370_s17, 16, %s372_s25, [#allocation12]  }
  0x1f   : > { %p162_p10 = scmp.eq.s32.totalorder %s1579_s24, 0  ;;  %s1950_s13 = smov (%p41_p8, %s40_s13), 0 }
  0x20   : > { %1927 = sst [smem:[#allocation21_spill]] %s1950_s13  ;;  %s1952_s15 = smov (!%p41_p8, %s43_s15), %s1575_s23 }
  0x21   : > { %s151_s29 = ssub.s32 %s1571_s22, %s1950_s13  ;;  %p163_p11 = por %p162_p10, %p161_p9 }
  0x22   : > { %p45_p12 = scmp.ge.s32.totalorder %s1952_s15, 2  ;;  %p152_p13 = scmp.eq.s32.totalorder %s151_s29, 0 }
  0x23   : > { %p1200_p0 = scmp.lt.s32.totalorder %s1579_s24, 8  ;;  %s1735_s25 = sand.u32 1, %s1559_s19  }
  0x24   : > { %s1954_s15 = smov (%p45_p12, %s1952_s15), 0  ;;  %s1912_s17 = sand.u32 1, %s1579_s24  }
  0x25   : > { %1928 = sst [smem:[#allocation22_spill]] %s1954_s15  ;;  %p1742_p2 = pnand %p1200_p0, %p163_p11 }
  0x26   : > { %s1740_s30 = scalar_select %p152_p13, %s1559_s19, %s154_s16  }
  0x27   : > { %s1931_s5 = sld [smem:[#allocation25_spill]]  ;;  %s445_s23 = scalar_lea.vmem [#allocation5], %s1735_s25 }
  0x28   : > { %1929 = sst [smem:[#allocation23_spill]] %s1740_s30  ;;  %s452_s11 = sshll.u32 %s445_s23, 4  ;;  %s453_s11 = int_to_ptr.vmem [resolvable:$true] %s452_s11 }
  0x29   : > { %s443_s16 = scalar_lea.sflag [#allocation6], %s1912_s17  ;;  %s1932_s10 = sld [smem:[#allocation28_spill]] }
  0x2a   : > { %s1583_s8 = smov [#allocation13]   ;;  %s1933_s4 = sld [smem:[#allocation24_spill]] }
  0x2b   : > { %s383_s9 = sshll.u32 %s1583_s8, 4  ;;  %s426_s15 = scalar_lea.sflag [#allocation4], %s1735_s25  ;;  %s384_s9 = int_to_ptr.vmem [resolvable:$true] %s383_s9 }
  0x2c   : > { %s465_s28 = scalar_lea.hbm %s1902_s6, %s1571_s22  ;;  %s1934_s30 = sand.u32 1, %s1579_s24  }
  0x2d   : > { %s448_s29 = scalar_lea.hbm %s1931_s5, %s1571_s22  ;;  %s428_s5 = scalar_lea.vmem [#allocation3], %s1735_s25 }
  0x2e   : > { %s450_s13 = sshll.u32 %s448_s29, 4  ;;  %s467_s23 = sshll.u32 %s465_s28, 4  ;;  %s451_s13 = int_to_ptr.hbm [resolvable:$true] %s450_s13  ;;  %s468_s23 = int_to_ptr.hbm [resolvable:$true] %s467_s23 }
  0x2f   : > { %1190 = dma.hbm_to_vmem [thread:$0]  (!%p1742_p2), %s451_s13, 16, %s453_s11, %s443_s16  }
  0x30   : > { %s381_s19 = sshll.u32 %s1932_s10, 4  ;;  %s431_s17 = scalar_lea.hbm %s1933_s4, %s1571_s22  ;;  %s382_s19 = int_to_ptr.hbm [resolvable:$true] %s381_s19 }
  0x31   : > { %1183 = dma.hbm_to_vmem [thread:$0]  (!%p1714_p7), %s382_s19, 16, %s384_s9, [#allocation12]  }
  0x32   : > { %s435_s11 = sshll.u32 %s428_s5, 4  ;;  %s433_s13 = sshll.u32 %s431_s17, 4  ;;  %s436_s11 = int_to_ptr.vmem [resolvable:$true] %s435_s11  ;;  %s434_s13 = int_to_ptr.hbm [resolvable:$true] %s433_s13 }
  0x33   : > { %1187 = dma.hbm_to_vmem [thread:$0]  (!%p1742_p2), %s434_s13, 16, %s436_s11, %s426_s15  }
  0x34   : > { %s462_s19 = scalar_lea.vmem [#allocation7], %s1735_s25  ;;  %s1096_s29 = sshll.u32 %s1735_s25, 2 }
  0x35   : > { %s469_s9 = sshll.u32 %s462_s19, 4  ;;  %s1097_s5 = sshll.u32 %s1571_s22, 2  ;;  %s470_s9 = int_to_ptr.vmem [resolvable:$true] %s469_s9 }
  0x36   : > { %1193 = dma.hbm_to_vmem [thread:$0]  (!%p1742_p2), %s468_s23, 16, %s470_s9, %s443_s16  }
  0x37   : > { %s484_s10 = scalar_lea.hbm %s1903_s7, %s1097_s5  ;;  %s480_s11 = scalar_lea.vmem [#allocation8], %s1096_s29 }
  0x38   : > { %s488_s13 = sshll.u32 %s480_s11, 4  ;;  %s486_s15 = sshll.u32 %s484_s10, 4  ;;  %s489_s13 = int_to_ptr.vmem [resolvable:$true] %s488_s13  ;;  %s487_s15 = int_to_ptr.hbm [resolvable:$true] %s486_s15 }
  0x39   : > { %s477_s8 = scalar_lea.sflag [#allocation9], %s1934_s30  ;;  %497 = sbr.rel (%p1703_p5) target bundleno = 1159 (0x487), region = 64 }
  0x3a   : > { %1196 = dma.hbm_to_vmem [thread:$0]  (!%p1742_p2), %s487_s15, 64, %s489_s13, %s477_s8  }
  0x3b   : > { %s1788_s25 = sand.u32 (!%p1703_p5), 1, %s1555_s18  }
  0x3c   : > { %s500_s4 = scalar_lea.sflag (!%p1703_p5), [#allocation4], %s1788_s25 }
  0x3e   : > { %1530 = dma.done.wait (%p1696_p4), %s500_s4, 16  }
  0x3f   : > { %1532 = vsyncadd (%p1696_p4), %s500_s4, 4294967280  ;;  %s1935_s10 = sadd.s32 4294967295, %s1579_s24  }
  0x40   : > { %s508_s14 = sand.u32 1, %s1935_s10  }
  0x41   : > { %s509_s12 = scalar_lea.sflag [#allocation6], %s508_s14 }
  0x42   : > { %1534 = dma.done.wait (%p1696_p4), %s509_s12, 32  }
  0x43   : > { %1536 = vsyncadd (%p1696_p4), %s509_s12, 4294967264  ;;  %s1099_s19 = sshll.u32 %s1788_s25, 2  ;;  %s527_s23 = scalar_lea.sflag [#allocation9], %s508_s14 }
  0x44   : > { %s1805_s29 = scalar_lea.vmem [#allocation8], %s1099_s19 }
  0x45   : > { %1538 = dma.done.wait (%p1696_p4), %s527_s23, 64  }
  0x46   : > { %1540 = vsyncadd (%p1696_p4), %s527_s23, 4294967232 }
  0x47   : > { %1542 = dma.done.wait (%p1688_p1), [#allocation9], 16  }
  0x48   : > { %1544 = vsyncadd (%p1688_p1), [#allocation9], 4294967280 }
  0x49   : > { %1546 = dma.done.wait (%p1688_p1), [#allocation12], 32  }
  0x4a   : > { %1548 = vsyncadd (%p1688_p1), [#allocation12], 4294967264  ;;  %p615_p3 = scmp.lt.s32.totalorder %s1567_s21, 1  ;;  %p619_p5 = scmp.lt.s32.totalorder %s1563_s20, 3 }
  0x4b   : > { %s1936_s28 = sld [smem:[#allocation29_spill]]  ;;  %p1111_p1 = scmp.ne.s32.totalorder %s1563_s20, 0 }
  0x4c   : > { %s1956_s21 = smov (!%p615_p3, %s1567_s21), 1 }
  0x4d   : > { %s620_s27 = scalar_select %p619_p5, %s1563_s20, 3 }
  0x4e   : > { %s1103_s5 = sshll.u32 %s1956_s21, 2  ;;  %642 = sbr.rel (%p1111_p1) target bundleno = 85 (0x55), region = 96 }
  0x4f   : > { %s618_s13 = scalar_lea.vmem %s1896_s0, %s1103_s5  ;;  %s1145_s15 = sshll.u32 %s620_s27, 4 }
  0x50   : > { %s623_s4 = scalar_lea.vmem %s1897_s1, %s1145_s15  ;;  %s628_s14 = scalar_lea.vmem %s1898_s2, %s1145_s15 }
  0x51   : > { %s1835_s23 = scalar_lea.vmem %s1899_s3, %s1145_s15  ;;  %s1840_s16 = scalar_lea.vmem %s1936_s28, %s1103_s5 }
  0x53   : > { %vm643_vm0 = vcmask 261120   ;;  %v1584_v0 = vmov 0.0  }
  0x54   : > { %644 = vst.msk [vmem:[#allocation2] sm:$0xff] %vm643_vm0, %v1584_v0 }
  0x55 PF: > { %v1149_v1 = vld [vmem:[%s623_s4 + $0x8] sm:$0xff]  ;;  %v1148_v3 = vld [vmem:[%s623_s4] sm:$0xff]  ;;  %vm666_vm1 = vcmask 261120   ;;  %s1937_s28 = scalar_lea.vmem [#allocation3], %s1788_s25  ;;  %s1938_s9 = scalar_lea.vmem [#allocation5], %s1788_s25  ;;  %vm752_vm2 = vcmask 64512  }
  0x56   : > { %v1151_v2 = vld [vmem:[%s628_s14 + $0x8] sm:$0xff]  ;;  %676 = vmatpush.bf16.msra.mxu0 %v1149_v1  ;;  %v1150_v4 = vld [vmem:[%s628_s14] sm:$0xff]  ;;  %s1939_s27 = scalar_lea.vmem [#allocation7], %s1788_s25  ;;  %vm788_vm3 = vcmask 1043456   ;;  %p1142_p4 = scmp.ne.s32.totalorder %s1563_s20, 3 }
  0x57   : > { %709 = vmatpush.bf16.msra.mxu1 %v1151_v2  ;;  %v1843_v5 = vld [vmem:[%s618_s13] sm:$0xf]  ;;  %v1153_v18 = vld [vmem:[%s1835_s23 + $0x8] sm:$0xff] }
  0x58   : > { %v1273_v6 = vld [vmem:[%s1937_s28] ss:$0 sm:$0xff]  ;;  %742 = vmatpush.bf16.msra.mxu2 %v1153_v18  ;;  %v807_v34 = vld [vmem:[%s1805_s29] sm:$0xf] }
  0x59   : > { %v1274_v7 = vld [vmem:[%s1938_s9] ss:$0 sm:$0xff]  ;;  %v812_v35 = vsel %vm788_vm3, %v807_v34, 0 }
  0x5a   : > { %677 = vmatpush.bf16.msra.mxu0 %v1148_v3  ;;  %v1152_v19 = vld [vmem:[%s1835_s23] sm:$0xff] }
  0x5b   : > { %710 = vmatpush.bf16.msra.mxu1 %v1150_v4  ;;  %v1275_v23 = vld [vmem:[%s1939_s27] ss:$0 sm:$0xff] }
  0x5c   : > { %743 = vmatpush.bf16.msra.mxu2 %v1152_v19  ;;  %v805_v43 = vld [vmem:[#allocation2] sm:$0xff] }
  0x5d   : > { %1120 = vmatmul.msk.bf16.vlgmr.msra.gmra.mxu0 %vm666_vm1, %v1843_v5 }
  0x5e   : > { %1129 = vmatmul.msk.bf16.vlgmr.msra.gmra.mxu1 %vm666_vm1, %v1843_v5 }
  0x5f   : > { %1138 = vmatmul.msk.bf16.vlgmr.msra.gmra.mxu2 %vm666_vm1, %v1843_v5  ;;  %821 = vmatpush.bf16.msrb.mxu1 %v812_v35 }
  0xda   : > { %v679_v8 = vpop.f32.mrf.mxu0 }
  0xdb   : > { %v712_v9 = vpop.f32.mrf.mxu1  ;;  %v680_v10 = vadd.f32 %v1273_v6, %v679_v8 }
  0xdc   : > { %v713_v11 = vadd.f32 %v1274_v7, %v712_v9 }
  0xdd   : > { %v749_v13 = vmul.f32 0.35355338, %v680_v10 }
  0xde   : > { %v751_v12 = vpack.c.bf16 %v713_v11, %v713_v11 }
  0xdf   : > { %v750_v17 = vpack.c.bf16 %v749_v13, %v749_v13 }
  0xe0   : > { %v757_v14 = vsel %vm752_vm2, %v751_v12, 0 }
  0xe1   : > { %766 = vmatpush.bf16.xpose.msra.mxu3 %v757_v14 }
  0xe2   : > { %v681_v15 = vpop.f32.mrf.mxu0  ;;  %v745_v24 = vpop.f32.mrf.mxu2 }
  0xe3   : > { %v714_v16 = vpop.f32.mrf.mxu1  ;;  %v746_v26 = vadd.f32 %v1275_v23, %v745_v24 }
  0xe5   : > { %v784_v28 = vpack.c.bf16 %v746_v26, %v746_v26 }
  0xe7   : > { %v790_v30 = vsel %vm788_vm3, %v784_v28, 0 }
  0xe8   : > { %1139 = vmatmul.msk.bf16.vlgmr.msra.gmra.mxu3 %vm752_vm2, %v750_v17  ;;  %799 = vmatpush.bf16.msrb.mxu0 %v790_v30 }
  0xea   : > { %v747_v31 = vpop.f32.mrf.mxu2 }
 0x16b   : > { %v768_v20 = vpop.f32.mrf.mxu3 }
 0x16c   : > { %v772_v21 = vsel %vm752_vm2, %v768_v20, -inf }
 0x16d   : > { %773 = vmax.xlane.f32.xlu0 %v772_v21 }
 0x173   : > { %v770_v22 = vpop.f32.mrf.mxu3 }
 0x1e0   : > { %v774_v25 = vpop.xlane.xlu0 %773 }
 0x1e1   : > { %v775_v27 = vsub.f32 %v768_v20, %v774_v25 }
 0x1e3   : > { %v776_v29 = vmul.f32 1.442695, %v775_v27 }
 0x1e5   : > { %1276 = vpow2.f32 %v776_v29 }
 0x1eb   : > { %v1277_v32 = vpop.eup %1276 }
 0x1ec   : > { %v778_v33 = vsel %vm752_vm2, %v1277_v32, 0.0 }
 0x1ed   : > { %779 = vadd.xlane.f32.xlu0 %v778_v33 }
 0x260   : > { %v780_v36 = vpop.xlane.xlu0 %779 }
 0x261   : > { %1278 = vrcp.f32 %v780_v36 }
 0x267   : > { %v1279_v37 = vpop.eup %1278 }
 0x268   : > { %v782_v38 = vmul.f32 %v1279_v37, %v1277_v32 }
 0x26a   : > { %v783_v39 = vpack.c.bf16 %v782_v38, %v782_v38 }
 0x26c   : > { %1140 = vmatmul.msk.bf16.vlgmr.msrb.gmra.mxu0 %vm752_vm2, %v783_v39 }
 0x2e9   : > { %v801_v40 = vpop.f32.mrf.mxu0 }
 0x2ea   : > { %v806_v41 = vpack.c.bf16 %v801_v40, %v801_v40 }
 0x2ec   : > { %1141 = vmatmul.msk.bf16.vlgmr.msrb.gmra.mxu1 %vm752_vm2, %v806_v41 }
 0x2f1   : > { %v803_v42 = vpop.f32.mrf.mxu0 }
 0x369   : > { %v823_v44 = vpop.f32.mrf.mxu1 }
 0x36a   : > { %v827_v45 = vadd.f32 %v823_v44, %v805_v43 }
 0x36c   : > { %828 = vst.msk [vmem:[#allocation2] sm:$0xff] %vm666_vm1, %v827_v45 }
 0x36d   : > { %832 = sbr.rel (%p1142_p4) target bundleno = 1159 (0x487), region = 100 }
 0x371   : > { %v825_v46 = vpop.f32.mrf.mxu1 }
 0x372   : > { %v1280_v48 = vld [vmem:[#allocation10] ss:$0 sm:$0xff]  ;;  %v839_v49 = vunpack.c.l.bf16 %v1843_v5  ;;  %v1585_v53 = vmov 32.0   ;;  %v1281_v10 = vld [vmem:[#allocation11] ss:$0 sm:$0xff]  ;;  %vm881_vm8 = vcmask 257024  }
 0x373   : > { %v833_v47 = vld [vmem:[#allocation2] sm:$0xff]  ;;  %1283 = vrcp.f32 %v1585_v53  ;;  %v1282_v12 = vld [vmem:[#allocation13] ss:$0 sm:$0xff] }
 0x374   : > { %v838_v50 = vadd.f32 %v1280_v48, %v833_v47 }
 0x376   : > { %v840_v51 = vadd.f32 %v839_v49, %v838_v50 }
 0x378   : > { %v841_v52 = vsel %vm666_vm1, %v840_v51, 0.0 }
 0x379   : > { %842 = vadd.xlane.f32.xlu0 %v841_v52  ;;  %v1284_v54 = vpop.eup %1283 }
 0x37a   : > { %v845_v55 = vmul.f32 32.0, %v1284_v54  ;;  %vm849_vm4 = vweird.f32 %v1284_v54 }
 0x37c   : > { %v846_v56 = vsub.f32 1.0, %v845_v55 }
 0x37e   : > { %v847_v57 = vmul.f32 %v1284_v54, %v846_v56 }
 0x380   : > { %v848_v58 = vadd.f32 %v1284_v54, %v847_v57 }
 0x382   : > { %v850_v59 = vsel %vm849_vm4, %v1284_v54, %v848_v58 }
 0x3ec   : > { %v843_v60 = vpop.xlane.xlu0 %842 }
 0x3ed   : > { %v851_v61 = vmul.f32 %v850_v59, %v843_v60 }
 0x3ef   : > { %v852_v62 = vsub.f32 %v840_v51, %v851_v61 }
 0x3f1   : > { %v853_v63 = vmul.f32 %v852_v62, %v852_v62 }
 0x3f3   : > { %v854_v0 = vsel %vm666_vm1, %v853_v63, 0.0 }
 0x3f4   : > { %855 = vadd.xlane.f32.xlu0 %v854_v0 }
 0x467   : > { %v856_v1 = vpop.xlane.xlu0 %855 }
 0x468   : > { %v857_v2 = vmul.f32 %v856_v1, %v850_v59 }
 0x46a   : > { %v858_v3 = vadd.f32 1e-05, %v857_v2 }
 0x46c   : > { %1285 = vrsqrt.f32 %v858_v3  ;;  %vm865_vm6 = vweird.f32 %v858_v3 }
 0x472   : > { %v1286_v4 = vpop.eup %1285 }
 0x473   : > { %v860_v5 = vmul.f32 %v1286_v4, %v858_v3  ;;  %vm866_vm5 = vweird.f32 %v1286_v4 }
 0x474   : > { %vm867_vm7 = vmor %vm865_vm6, %vm866_vm5 }
 0x475   : > { %v861_v6 = vmul.f32 %v1286_v4, %v860_v5 }
 0x477   : > { %v862_v7 = vmul.f32 0.5, %v861_v6 }
 0x479   : > { %v863_v8 = vsub.f32 1.5, %v862_v7 }
 0x47b   : > { %v864_v9 = vmul.f32 %v1286_v4, %v863_v8 }
 0x47d   : > { %v868_v11 = vsel %vm867_vm7, %v1286_v4, %v864_v9 }
 0x47e   : > { %v869_v13 = vmul.f32 %v868_v11, %v852_v62 }
 0x480   : > { %v874_v14 = vmul.f32 %v1281_v10, %v869_v13 }
 0x482   : > { %v879_v15 = vadd.f32 %v1282_v12, %v874_v14 }
 0x484   : > { %v880_v16 = vpack.c.bf16 %v879_v15, %v879_v15 }
 0x486   : > { %882 = vst.msk [vmem:[%s1840_s16] sm:$0xf] %vm881_vm8, %v880_v16 }
 0x487 PF: > { %s31_s24 = sadd.s32 1, %s1579_s24   ;;  %s1940_s20 = sld [smem:[#allocation19_spill]] }
 0x488   : > { %p28_p6 = scmp.ge.s32.totalorder %s31_s24, 10   ;;  %s1941_s19 = sld [smem:[#allocation23_spill]] }
 0x489   : > { %s1942_s21 = sld [smem:[#allocation20_spill]]  ;;  %s1945_s17 = smov %s1555_s18 }
 0x48a   : > { %s1943_s25 = sld [smem:[#allocation21_spill]] }
 0x48b   : > { %s1944_s23 = sld [smem:[#allocation22_spill]] }
 0x48c   :  { %30 = sbr.rel (!%p28_p6) target bundleno = 17 (0x11), region = 173 }
 0x48d   : > { %s1946_s18 = smov %s1940_s20  ;;  %s1947_s20 = smov %s1571_s22 }
 0x490   : > { %s1948_s22 = smov %s1943_s25 }
 0x491   :  { %902 = vsyncpa [#allocation4], 1 }
 0x492   :  { %904 = vsyncpa [#allocation4 + $0x1], 1 }
 0x493   :  { %905 = vsyncpa [#allocation6], 1 }
 0x494   :  { %907 = vsyncpa [#allocation6 + $0x1], 1 }
 0x495   :  { %908 = vsyncpa [#allocation9], 1 }
 0x496   :  { %910 = vsyncpa [#allocation9 + $0x1], 1 }
 0x497   :  { %911 = vsyncpa [#allocation12], 1 }

// kernel: transformer_classifier_forward.9
= control target key start
LH: loop header
LB: loop body
LE: loop exit
PB: predicated region body
PF: predicated region fallthrough
CT: control target
= control target key end

     0   :  { %s1402_s24 = smov 0   ;;  %s1404_s25 = smov 0   ;;  %s1568_s0 = inlined_call_operand.vmem [shape: bf16[16,32], index: 0, kind: input, shape index: {}]   ;;  %s1569_s1 = inlined_call_operand.vmem [shape: bf16[32,2048], index: 1, kind: input, shape index: {}]   ;;  %s1570_s2 = inlined_call_operand.vmem [shape: f32[1,2048], index: 2, kind: input, shape index: {}]   ;;  %s1571_s3 = inlined_call_operand.vmem [shape: bf16[2048,32], index: 3, kind: input, shape index: {}]   ;;  %s1572_s4 = inlined_call_operand.vmem [shape: f32[1,32], index: 4, kind: input, shape index: {}]   ;;  %s1573_s5 = inlined_call_operand.vmem [shape: f32[1,32], index: 5, kind: input, shape index: {}]   ;;  %s1574_s6 = inlined_call_operand.vmem [shape: f32[1,32], index: 6, kind: input, shape index: {}]   ;;  %s1575_s7 = inlined_call_operand.vmem [shape: bf16[16,32], index: 7, kind: output, shape index: {}]  }
   0x1   :  { %s1406_s26 = smov 0   ;;  %s1408_s27 = smov 0  }
   0x2   :  { %s1410_s28 = smov 0  }
   0x3 LB: > { %s26_s29 = sadd.s32 1, %s1354_s27  ;;  %p69_p1 = scmp.ne.s32.totalorder %s1346_s25, %s1342_s24  ;;  %s1358_s28 = sphi %s1410_s28, %s17_s28   ;;  %s1354_s27 = sphi %s1408_s27, %s1579_s27   ;;  %s1350_s26 = sphi %s1406_s26, %s1578_s26   ;;  %s1346_s25 = sphi %s1404_s25, %s1577_s25   ;;  %s1342_s24 = sphi %s1402_s24, %s1576_s24  }
   0x4   : > { %p27_p0 = scmp.ge.s32.totalorder %s26_s29, 4  ;;  %p70_p2 = scmp.eq.s32.totalorder %s1358_s28, 0 }
   0x5   : > { %s62_s8 = sadd.s32 1, %s1346_s25  ;;  %p1044_p5 = scmp.ge.s32.totalorder %s1358_s28, 4 }
   0x6   : > { %s1581_s29 = smov (%p27_p0, %s26_s29), 0  ;;  %p71_p3 = por %p70_p2, %p69_p1 }
   0x7   : > { %s59_s30 = ssub.s32 %s1354_s27, %s1581_s29  ;;  %254 = sbr.rel (%p1044_p5) target bundleno = 24 (0x18), region = 32 }
   0x8   : > { %p60_p4 = scmp.eq.s32.totalorder %s59_s30, 0 }
   0xa   : > { %s1437_s9 = scalar_select %p60_p4, %s1346_s25, %s62_s8  }
   0xc   : > { %257 = sbr.rel (!%p71_p3) target bundleno = 24 (0x18), region = 36  ;;  %s259_s10 = sand.u32 (%p71_p3), 1, %s1346_s25  }
   0xd   : > { %s1227_s11 = sshll.u32 (%p71_p3), %s1354_s27, 4  ;;  %s1045_s12 = sshll.u32 (%p71_p3), %s259_s10, 6 }
   0xe   : > { %s264_s15 = scalar_lea.vmem (%p71_p3), %s1569_s1, %s1227_s11  ;;  %s261_s16 = scalar_lea.vmem (%p71_p3), [#allocation3], %s1045_s12 }
   0xf   : > { %v277_v0 = vld [vmem:[%s264_s15] sm:$0xff] (%p71_p3)  ;;  %v279_v1 = vld [vmem:[%s264_s15 + $0x8] sm:$0xff] (%p71_p3) }
  0x10   : > { %v281_v2 = vld [vmem:[%s264_s15 + $0x40] sm:$0xff] (%p71_p3)  ;;  %278 = vst [vmem:[%s261_s16] sm:$0xff] (%p71_p3), %v277_v0  ;;  %v283_v3 = vld [vmem:[%s264_s15 + $0x48] sm:$0xff] (%p71_p3) }
  0x11   : > { %280 = vst [vmem:[%s261_s16 + $0x8] sm:$0xff] %v279_v1  ;;  %v285_v4 = vld [vmem:[%s264_s15 + $0x80] sm:$0xff]  ;;  %v287_v5 = vld [vmem:[%s264_s15 + $0x88] sm:$0xff] }
  0x12   : > { %282 = vst [vmem:[%s261_s16 + $0x10] sm:$0xff] %v281_v2  ;;  %v289_v6 = vld [vmem:[%s264_s15 + $0xc0] sm:$0xff]  ;;  %v291_v7 = vld [vmem:[%s264_s15 + $0xc8] sm:$0xff] }
  0x13   : > { %284 = vst [vmem:[%s261_s16 + $0x18] sm:$0xff] %v283_v3 }
  0x14   : > { %286 = vst [vmem:[%s261_s16 + $0x20] sm:$0xff] %v285_v4 }
  0x15   : > { %288 = vst [vmem:[%s261_s16 + $0x28] sm:$0xff] %v287_v5 }
  0x16   : > { %290 = vst [vmem:[%s261_s16 + $0x30] sm:$0xff] %v289_v6 }
  0x17   : > { %292 = vst [vmem:[%s261_s16 + $0x38] sm:$0xff] %v291_v7 }
  0x18 PF: > { %p1048_p6 = scmp.ge.s32.totalorder %s1358_s28, 1  ;;  %p314_p7 = scmp.lt.s32.totalorder %s1358_s28, 5 }
  0x1a   : > { %p315_p8 = pnand %p1048_p6, %p314_p7 }
  0x1b   : > { %s321_s17 = sand.u32 (!%p315_p8), 1, %s1342_s24   ;;  %s1050_s18 = sshll.u32 (!%p315_p8), %s1350_s26, 2 }
  0x1c   : > { %318 = sbr.rel (%p315_p8) target bundleno = 635 (0x27b), region = 67  ;;  %s1049_s19 = sshll.u32 (!%p315_p8), %s321_s17, 6 }
  0x1d   : > { %p374_p9 = scmp.lt.s32.totalorder (!%p315_p8), %s1050_s18, 15  ;;  %s1051_s20 = sshll.u32 (!%p315_p8), %s1350_s26, 6 }
  0x1e   : > { %p379_p10 = scmp.lt.s32.totalorder (!%p315_p8), %s1051_s20, 255  ;;  %s1461_s24 = scalar_lea.vmem (!%p315_p8), [#allocation3], %s1049_s19 }
  0x1f   : > { %p1053_p11 = scmp.ne.s32.totalorder (!%p315_p8), %s1350_s26, 0 }
  0x21   : > { %s1583_s18 = smov (!%p374_p9, %s1050_s18), 15  ;;  %s1585_s20 = smov (!%p379_p10, %s1051_s20), 255 }
  0x22   : > { %s376_s23 = scalar_lea.vmem %s1570_s2, %s1583_s18  ;;  %s1052_s30 = sshll.u32 %s1585_s20, 2 }
  0x23   : > { %s1459_s11 = scalar_lea.vmem %s1571_s3, %s1052_s30  ;;  %394 = sbr.rel (%p1053_p11) target bundleno = 43 (0x2b), region = 75 }
  0x28   : > { %vm395_vm0 = vcmask 261120   ;;  %v1360_v8 = vmov 0.0  }
  0x29   : > { %396 = vst.msk [vmem:[#allocation2] sm:$0xff] %vm395_vm0, %v1360_v8 }
  0x2a   : > { %397 = vst.msk [vmem:[#allocation2 + $0x8] sm:$0xff] %vm395_vm0, %v1360_v8 }
  0x2b PF: > { %v1467_v9 = vld [vmem:[%s1568_s0] sm:$0xff]   ;;  %v1076_v10 = vld [vmem:[%s1461_s24 + $0x20] sm:$0xf]  ;;  %v1233_v13 = vld [vmem:[%s1461_s24 + $0x24] sm:$0xf]  ;;  %vm463_vm1 = vcmask 261120  }
  0x2c   : > { %v1235_v11 = vld [vmem:[%s1461_s24 + $0x2c] sm:$0xf0]  ;;  %v1078_v14 = vld [vmem:[%s1461_s24 + $0x30] sm:$0xf0]  ;;  %v1084_v15 = vld [vmem:[%s1461_s24 + $0x28] sm:$0xf] }
  0x2d   : > { %v1077_v12 = vor.u32 %v1235_v11, %v1076_v10  ;;  %v1081_v16 = vor.u32 %v1233_v13, %v1078_v14  ;;  %v1236_v17 = vld [vmem:[%s1461_s24 + $0x34] sm:$0xf0]  ;;  %v1234_v18 = vld [vmem:[%s1461_s24 + $0x2c] sm:$0xf]  ;;  %v1086_v19 = vld [vmem:[%s1461_s24 + $0x38] sm:$0xf0] }
  0x2e   : > { %v1085_v20 = vor.u32 %v1236_v17, %v1084_v15  ;;  %v1089_v21 = vor.u32 %v1234_v18, %v1086_v19  ;;  %v1060_v22 = vld [vmem:[%s1461_s24] sm:$0xf]  ;;  %v1231_v23 = vld [vmem:[%s1461_s24 + $0xc] sm:$0xf0]  ;;  %v1229_v24 = vld [vmem:[%s1461_s24 + $0x4] sm:$0xf] }
  0x2f   : > { %473 = vmatpush.bf16.msra.mxu0 %v1077_v12  ;;  %487 = vmatpush.bf16.msra.mxu1 %v1081_v16  ;;  %v1061_v25 = vor.u32 %v1231_v23, %v1060_v22  ;;  %v1062_v26 = vld [vmem:[%s1461_s24 + $0x10] sm:$0xf0]  ;;  %v1068_v27 = vld [vmem:[%s1461_s24 + $0x8] sm:$0xf]  ;;  %v1232_v28 = vld [vmem:[%s1461_s24 + $0x14] sm:$0xf0] }
  0x30   : > { %501 = vmatpush.bf16.msra.mxu2 %v1085_v20  ;;  %515 = vmatpush.bf16.msra.mxu3 %v1089_v21  ;;  %v1065_v29 = vor.u32 %v1229_v24, %v1062_v26  ;;  %v1069_v30 = vor.u32 %v1232_v28, %v1068_v27  ;;  %v1230_v31 = vld [vmem:[%s1461_s24 + $0xc] sm:$0xf]  ;;  %v1070_v32 = vld [vmem:[%s1461_s24 + $0x18] sm:$0xf0]  ;;  %v1228_v34 = vld [vmem:[%s1568_s0] sm:$0xff]  ;;  %p1222_p12 = scmp.ne.s32.totalorder %s1350_s26, 3 }
  0x31   : > { %v1073_v33 = vor.u32 %v1230_v31, %v1070_v32  ;;  %v1244_v35 = vld [vmem:[%s1459_s11 + $0x38] sm:$0xff]  ;;  %v1243_v38 = vld [vmem:[%s1459_s11 + $0x30] sm:$0xff]  ;;  %v1242_v42 = vld [vmem:[%s1459_s11 + $0x28] sm:$0xff] }
  0x32   : > { %v1252_v36 = vld [vmem:[%s1459_s11 + $0x78] sm:$0xff]  ;;  %v1251_v40 = vld [vmem:[%s1459_s11 + $0x70] sm:$0xff]  ;;  %v1250_v44 = vld [vmem:[%s1459_s11 + $0x68] sm:$0xff] }
  0x33   : > { %474 = vmatpush.bf16.msra.mxu0 %v1061_v25  ;;  %v1260_v37 = vld [vmem:[%s1459_s11 + $0xb8] sm:$0xff]  ;;  %488 = vmatpush.bf16.msra.mxu1 %v1065_v29  ;;  %v1259_v41 = vld [vmem:[%s1459_s11 + $0xb0] sm:$0xff]  ;;  %v1258_v45 = vld [vmem:[%s1459_s11 + $0xa8] sm:$0xff] }
  0x34   : > { %502 = vmatpush.bf16.msra.mxu2 %v1069_v30  ;;  %516 = vmatpush.bf16.msra.mxu3 %v1073_v33  ;;  %v1268_v39 = vld [vmem:[%s1459_s11 + $0xf8] sm:$0xff]  ;;  %v1267_v43 = vld [vmem:[%s1459_s11 + $0xf0] sm:$0xff]  ;;  %v1241_v46 = vld [vmem:[%s1459_s11 + $0x20] sm:$0xff] }
  0x35   : > { %v1266_v47 = vld [vmem:[%s1459_s11 + $0xe8] sm:$0xff]  ;;  %v1249_v48 = vld [vmem:[%s1459_s11 + $0x60] sm:$0xff]  ;;  %v1240_v49 = vld [vmem:[%s1459_s11 + $0x18] sm:$0xff] }
  0x36   : > { %1090 = vmatmul.msk.bf16.vlgmr.msra.gmra.mxu0 %vm463_vm1, %v1228_v34  ;;  %1091 = vmatmul.msk.bf16.vlgmr.msra.gmra.mxu1 %vm463_vm1, %v1228_v34  ;;  %v1248_v50 = vld [vmem:[%s1459_s11 + $0x58] sm:$0xff]  ;;  %v1257_v51 = vld [vmem:[%s1459_s11 + $0xa0] sm:$0xff]  ;;  %v1239_v53 = vld [vmem:[%s1459_s11 + $0x10] sm:$0xff] }
  0x37   : > { %793 = vmatpush.bf16.msrb.mxu0 %v1244_v35  ;;  %807 = vmatpush.bf16.msrb.mxu1 %v1252_v36  ;;  %v1265_v52 = vld [vmem:[%s1459_s11 + $0xe0] sm:$0xff]  ;;  %v1247_v54 = vld [vmem:[%s1459_s11 + $0x50] sm:$0xff]  ;;  %v1256_v55 = vld [vmem:[%s1459_s11 + $0x98] sm:$0xff] }
  0x38   : > { %821 = vmatpush.bf16.msrb.mxu2 %v1260_v37  ;;  %1093 = vmatmul.msk.bf16.vlgmr.msra.gmra.mxu3 %vm463_vm1, %v1228_v34  ;;  %v1264_v56 = vld [vmem:[%s1459_s11 + $0xd8] sm:$0xff]  ;;  %v1238_v57 = vld [vmem:[%s1459_s11 + $0x8] sm:$0xff]  ;;  %v1255_v59 = vld [vmem:[%s1459_s11 + $0x90] sm:$0xff] }
  0x39   : > { %1092 = vmatmul.msk.bf16.vlgmr.msra.gmra.mxu2 %vm463_vm1, %v1228_v34  ;;  %835 = vmatpush.bf16.msrb.mxu3 %v1268_v39  ;;  %v1246_v58 = vld [vmem:[%s1459_s11 + $0x48] sm:$0xff]  ;;  %v1263_v60 = vld [vmem:[%s1459_s11 + $0xd0] sm:$0xff]  ;;  %v1237_v61 = vld [vmem:[%s1459_s11] sm:$0xff] }
  0x3a   : > { %v1245_v62 = vld [vmem:[%s1459_s11 + $0x40] sm:$0xff]  ;;  %v1254_v63 = vld [vmem:[%s1459_s11 + $0x88] sm:$0xff] }
  0x3b   : > { %794 = vmatpush.bf16.msrb.mxu0 %v1243_v38  ;;  %808 = vmatpush.bf16.msrb.mxu1 %v1251_v40  ;;  %v1262_v0 = vld [vmem:[%s1459_s11 + $0xc8] sm:$0xff]  ;;  %v1253_v1 = vld [vmem:[%s1459_s11 + $0x80] sm:$0xff] }
  0x3c   : > { %822 = vmatpush.bf16.msrb.mxu2 %v1259_v41  ;;  %v1261_v2 = vld [vmem:[%s1459_s11 + $0xc0] sm:$0xff] }
  0x3d   : > { %836 = vmatpush.bf16.msrb.mxu3 %v1267_v43  ;;  %v408_v4 = vld [vmem:[%s376_s23] sm:$0xf] }
  0x3e   : > { %v410_v6 = vperm.slane %v408_v4, 0  ;;  %v411_v7 = vperm.slane %v408_v4, 1  ;;  %v412_v19 = vperm.slane %v408_v4, 2  ;;  %v413_v20 = vperm.slane %v408_v4, 3  ;;  %v531_v43 = vld [vmem:[#allocation2] sm:$0xff] }
  0x3f   : > { %795 = vmatpush.bf16.msrb.mxu0 %v1242_v42  ;;  %809 = vmatpush.bf16.msrb.mxu1 %v1250_v44 }
  0x40   : > { %823 = vmatpush.bf16.msrb.mxu2 %v1258_v45 }
  0x41   : > { %837 = vmatpush.bf16.msrb.mxu3 %v1266_v47 }
  0x43   : > { %796 = vmatpush.bf16.msrb.mxu0 %v1241_v46  ;;  %810 = vmatpush.bf16.msrb.mxu1 %v1249_v48 }
  0x44   : > { %824 = vmatpush.bf16.msrb.mxu2 %v1257_v51  ;;  %v532_v51 = vld [vmem:[#allocation2 + $0x8] sm:$0xff] }
  0x45   : > { %838 = vmatpush.bf16.msrb.mxu3 %v1265_v52 }
  0x47   : > { %797 = vmatpush.bf16.msrb.mxu0 %v1240_v49  ;;  %811 = vmatpush.bf16.msrb.mxu1 %v1248_v50 }
  0x48   : > { %825 = vmatpush.bf16.msrb.mxu2 %v1256_v55 }
  0x49   : > { %839 = vmatpush.bf16.msrb.mxu3 %v1264_v56 }
  0x4b   : > { %798 = vmatpush.bf16.msrb.mxu0 %v1239_v53  ;;  %812 = vmatpush.bf16.msrb.mxu1 %v1247_v54 }
  0x4c   : > { %826 = vmatpush.bf16.msrb.mxu2 %v1255_v59 }
  0x4d   : > { %840 = vmatpush.bf16.msrb.mxu3 %v1263_v60 }
  0x4f   : > { %799 = vmatpush.bf16.msrb.mxu0 %v1238_v57  ;;  %813 = vmatpush.bf16.msrb.mxu1 %v1246_v58 }
  0x50   : > { %827 = vmatpush.bf16.msrb.mxu2 %v1254_v63 }
  0x51   : > { %841 = vmatpush.bf16.msrb.mxu3 %v1262_v0 }
  0x53   : > { %800 = vmatpush.bf16.msrb.mxu0 %v1237_v61  ;;  %814 = vmatpush.bf16.msrb.mxu1 %v1245_v62 }
  0x54   : > { %828 = vmatpush.bf16.msrb.mxu2 %v1253_v1 }
  0x55   : > { %842 = vmatpush.bf16.msrb.mxu3 %v1261_v2 }
  0xb3   : > { %v476_v3 = vpop.f32.mrf.mxu0  ;;  %v490_v5 = vpop.f32.mrf.mxu1 }
  0xb4   : > { %v477_v8 = vadd.f32 %v476_v3, %v410_v6  ;;  %v491_v10 = vadd.f32 %v490_v5, %v411_v7 }
  0xb6   : > { %v523_v15 = vmax.f32 %v477_v8, 0.0  ;;  %v524_v16 = vmax.f32 %v491_v10, 0.0 }
  0xbb   : > { %v518_v12 = vpop.f32.mrf.mxu3  ;;  %v478_v13 = vpop.f32.mrf.mxu0 }
  0xbc   : > { %v504_v11 = vpop.f32.mrf.mxu2  ;;  %v492_v14 = vpop.f32.mrf.mxu1  ;;  %v479_v17 = vadd.f32 %v478_v13, %v410_v6  ;;  %v519_v26 = vadd.f32 %v518_v12, %v413_v20 }
  0xbd   : > { %v493_v18 = vadd.f32 %v492_v14, %v411_v7  ;;  %v505_v25 = vadd.f32 %v504_v11, %v412_v19 }
  0xbe   : > { %v527_v21 = vmax.f32 %v479_v17, 0.0  ;;  %v526_v32 = vmax.f32 %v519_v26, 0.0 }
  0xbf   : > { %v528_v22 = vmax.f32 %v493_v18, 0.0  ;;  %v525_v31 = vmax.f32 %v505_v25, 0.0 }
  0xc0   : > { %v533_v23 = vpack.c.bf16 %v527_v21, %v523_v15 }
  0xc1   : > { %v534_v24 = vpack.c.bf16 %v528_v22, %v524_v16 }
  0xc2   : > { %801 = vmatmul.bf16.vlgmr.msrb.gmra.mxu0 %v533_v23 }
  0xc3   : > { %v520_v28 = vpop.f32.mrf.mxu3  ;;  %815 = vmatmul.bf16.vlgmr.msrb.gmra.mxu1 %v534_v24 }
  0xc4   : > { %v506_v27 = vpop.f32.mrf.mxu2  ;;  %v521_v30 = vadd.f32 %v520_v28, %v413_v20 }
  0xc5   : > { %v507_v29 = vadd.f32 %v506_v27, %v412_v19 }
  0xc6   : > { %v530_v34 = vmax.f32 %v521_v30, 0.0 }
  0xc7   : > { %v529_v33 = vmax.f32 %v507_v29, 0.0 }
  0xc8   : > { %v536_v36 = vpack.c.bf16 %v530_v34, %v526_v32 }
  0xc9   : > { %v535_v35 = vpack.c.bf16 %v529_v33, %v525_v31 }
  0xca   : > { %843 = vmatmul.bf16.vlgmr.msrb.gmra.mxu3 %v536_v36 }
  0xcb   : > { %829 = vmatmul.bf16.vlgmr.msrb.gmra.mxu2 %v535_v35 }
 0x13f   : > { %v802_v37 = vpop.f32.mrf.mxu0 }
 0x140   : > { %v816_v38 = vpop.f32.mrf.mxu1 }
 0x141   : > { %v817_v39 = vadd.f32 %v816_v38, %v802_v37 }
 0x147   : > { %v804_v45 = vpop.f32.mrf.mxu0 }
 0x148   : > { %v818_v46 = vpop.f32.mrf.mxu1 }
 0x149   : > { %v819_v48 = vadd.f32 %v818_v46, %v804_v45 }
 0x14d   : > { %v844_v41 = vpop.f32.mrf.mxu3 }
 0x14e   : > { %v830_v40 = vpop.f32.mrf.mxu2 }
 0x14f   : > { %v831_v42 = vadd.f32 %v830_v40, %v817_v39 }
 0x151   : > { %v845_v44 = vadd.f32 %v844_v41, %v831_v42 }
 0x153   : > { %v849_v47 = vadd.f32 %v845_v44, %v531_v43 }
 0x155   : > { %851 = vst.msk [vmem:[#allocation2] sm:$0xff] %vm463_vm1, %v849_v47  ;;  %v846_v52 = vpop.f32.mrf.mxu3 }
 0x156   : > { %v832_v49 = vpop.f32.mrf.mxu2 }
 0x157   : > { %v833_v50 = vadd.f32 %v832_v49, %v819_v48 }
 0x159   : > { %v847_v53 = vadd.f32 %v846_v52, %v833_v50  ;;  %856 = sbr.rel (%p1222_p12) target bundleno = 635 (0x27b), region = 79 }
 0x15b   : > { %v850_v54 = vadd.f32 %v847_v53, %v532_v51 }
 0x15d   : > { %852 = vst.msk [vmem:[#allocation2 + $0x8] sm:$0xff] %vm463_vm1, %v850_v54 }
 0x15e   : > { %v857_v55 = vld [vmem:[#allocation2] sm:$0xff]  ;;  %v865_v57 = vunpack.c.l.bf16 %v1467_v9  ;;  %v866_v62 = vunpack.c.h.bf16 %v1467_v9  ;;  %v1361_v2 = vmov 32.0   ;;  %vm934_vm7 = vcmask 257024  }
 0x15f   : > { %v1311_v56 = vld [vmem:[%s1572_s4] ss:$0 sm:$0xff]  ;;  %1314 = vrcp.f32 %v1361_v2 }
 0x160   : > { %v863_v59 = vadd.f32 %v1311_v56, %v857_v55  ;;  %v1312_v33 = vld [vmem:[%s1573_s5] ss:$0 sm:$0xff] }
 0x161   : > { %v1313_v36 = vld [vmem:[%s1574_s6] ss:$0 sm:$0xff] }
 0x162   : > { %v867_v60 = vadd.f32 %v865_v57, %v863_v59 }
 0x164   : > { %v858_v58 = vld [vmem:[#allocation2 + $0x8] sm:$0xff]  ;;  %v869_v63 = vsel %vm463_vm1, %v867_v60, 0.0 }
 0x165   : > { %v864_v61 = vadd.f32 %v1311_v56, %v858_v58  ;;  %870 = vadd.xlane.f32.xlu0 %v869_v63  ;;  %v1315_v3 = vpop.eup %1314 }
 0x166   : > { %v876_v4 = vmul.f32 32.0, %v1315_v3  ;;  %vm880_vm2 = vweird.f32 %v1315_v3 }
 0x167   : > { %v868_v0 = vadd.f32 %v866_v62, %v864_v61 }
 0x168   : > { %v877_v5 = vsub.f32 1.0, %v876_v4 }
 0x169   : > { %v872_v1 = vsel %vm463_vm1, %v868_v0, 0.0 }
 0x16a   : > { %v878_v6 = vmul.f32 %v1315_v3, %v877_v5 }
 0x16c   : > { %v879_v7 = vadd.f32 %v1315_v3, %v878_v6 }
 0x16d   : > { %873 = vadd.xlane.f32.xlu0 %v872_v1 }
 0x16e   : > { %v881_v8 = vsel %vm880_vm2, %v1315_v3, %v879_v7 }
 0x1d8   : > { %v871_v10 = vpop.xlane.xlu0 %870 }
 0x1d9   : > { %v882_v11 = vmul.f32 %v881_v8, %v871_v10 }
 0x1db   : > { %v884_v12 = vsub.f32 %v867_v60, %v882_v11 }
 0x1dd   : > { %v886_v9 = vmul.f32 %v884_v12, %v884_v12 }
 0x1df   : > { %v888_v13 = vsel %vm463_vm1, %v886_v9, 0.0 }
 0x1e0   : > { %889 = vadd.xlane.f32.xlu1 %v888_v13  ;;  %v874_v14 = vpop.xlane.xlu0 %873 }
 0x1e1   : > { %v883_v15 = vmul.f32 %v881_v8, %v874_v14 }
 0x1e3   : > { %v885_v16 = vsub.f32 %v868_v0, %v883_v15 }
 0x1e5   : > { %v887_v17 = vmul.f32 %v885_v16, %v885_v16 }
 0x1e7   : > { %v891_v18 = vsel %vm463_vm1, %v887_v17, 0.0 }
 0x1e8   : > { %892 = vadd.xlane.f32.xlu1 %v891_v18 }
 0x253   : > { %v890_v19 = vpop.xlane.xlu1 %889 }
 0x254   : > { %v894_v20 = vmul.f32 %v890_v19, %v881_v8 }
 0x256   : > { %v896_v21 = vadd.f32 1e-05, %v894_v20 }
 0x258   : > { %1316 = vrsqrt.f32 %v896_v21  ;;  %vm904_vm4 = vweird.f32 %v896_v21 }
 0x25b   : > { %v893_v22 = vpop.xlane.xlu1 %892 }
 0x25c   : > { %v895_v23 = vmul.f32 %v893_v22, %v881_v8 }
 0x25e   : > { %v1317_v24 = vpop.eup %1316  ;;  %v897_v25 = vadd.f32 1e-05, %v895_v23 }
 0x25f   : > { %v899_v26 = vmul.f32 %v1317_v24, %v896_v21  ;;  %vm905_vm3 = vweird.f32 %v1317_v24 }
 0x260   : > { %1318 = vrsqrt.f32 %v897_v25  ;;  %vm906_vm5 = vmor %vm904_vm4, %vm905_vm3  ;;  %vm914_vm8 = vweird.f32 %v897_v25 }
 0x261   : > { %v900_v27 = vmul.f32 %v1317_v24, %v899_v26 }
 0x263   : > { %v901_v28 = vmul.f32 0.5, %v900_v27 }
 0x265   : > { %v902_v29 = vsub.f32 1.5, %v901_v28 }
 0x266   : > { %v1319_v30 = vpop.eup %1318 }
 0x267   : > { %v903_v31 = vmul.f32 %v1317_v24, %v902_v29  ;;  %v909_v32 = vmul.f32 %v1319_v30, %v897_v25  ;;  %vm915_vm6 = vweird.f32 %v1319_v30 }
 0x268   : > { %vm916_vm9 = vmor %vm914_vm8, %vm915_vm6 }
 0x269   : > { %v907_v34 = vsel %vm906_vm5, %v1317_v24, %v903_v31  ;;  %v910_v35 = vmul.f32 %v1319_v30, %v909_v32 }
 0x26a   : > { %v918_v37 = vmul.f32 %v907_v34, %v884_v12 }
 0x26b   : > { %v911_v38 = vmul.f32 0.5, %v910_v35 }
 0x26c   : > { %v924_v39 = vmul.f32 %v1312_v33, %v918_v37 }
 0x26d   : > { %v912_v40 = vsub.f32 1.5, %v911_v38 }
 0x26e   : > { %v930_v41 = vadd.f32 %v1313_v36, %v924_v39 }
 0x26f   : > { %v913_v42 = vmul.f32 %v1319_v30, %v912_v40 }
 0x270   : > { %v932_v43 = vpack.c.bf16 %v930_v41, %v930_v41 }
 0x271   : > { %v917_v44 = vsel %vm916_vm9, %v1319_v30, %v913_v42 }
 0x272   : > { %935 = vst.msk [vmem:[%s1575_s7] sm:$0xf] %vm934_vm7, %v932_v43  ;;  %v919_v45 = vmul.f32 %v917_v44, %v885_v16 }
 0x274   : > { %v925_v46 = vmul.f32 %v1312_v33, %v919_v45 }
 0x276   : > { %v931_v47 = vadd.f32 %v1313_v36, %v925_v46 }
 0x278   : > { %v933_v48 = vpack.c.bf16 %v931_v47, %v931_v47 }
 0x27a   : > { %936 = vst.msk [vmem:[%s1575_s7 + $0x4] sm:$0xf] %vm934_vm7, %v933_v48 }
 0x27b PF: > { %s17_s28 = sadd.s32 1, %s1358_s28   ;;  %s1576_s24 = smov %s1346_s25 }
 0x27c   : > { %p14_p13 = scmp.ge.s32.totalorder %s17_s28, 6   ;;  %s1577_s25 = smov %s1437_s9 }
 0x27d   : > { %s1578_s26 = smov %s1354_s27  ;;  %s1579_s27 = smov %s1581_s29 }
 0x27e   :  { %16 = sbr.rel (!%p14_p13) target bundleno = 3 (0x3), region = 123 }

// kernel: transformer_classifier_forward.10
= control target key start
LH: loop header
LB: loop body
LE: loop exit
PB: predicated region body
PF: predicated region fallthrough
CT: control target
= control target key end

     0   :  { %s1112_s17 = smov 0   ;;  %s1114_s18 = smov 0   ;;  %s1239_s0 = inlined_call_operand.vmem [shape: bf16[2,8,32], index: 0, kind: input, shape index: {}]   ;;  %s1240_s1 = inlined_call_operand.vmem [shape: bf16[4,32,8], index: 1, kind: input, shape index: {}]   ;;  %s1241_s2 = inlined_call_operand.vmem [shape: bf16[4,32,8], index: 2, kind: input, shape index: {}]   ;;  %s1242_s3 = inlined_call_operand.vmem [shape: bf16[4,32,8], index: 3, kind: input, shape index: {}]   ;;  %s1243_s4 = inlined_call_operand.vmem [shape: f32[4,1,8], index: 4, kind: input, shape index: {}]   ;;  %s1244_s5 = inlined_call_operand.vmem [shape: f32[4,1,8], index: 5, kind: input, shape index: {}]   ;;  %s1245_s6 = inlined_call_operand.vmem [shape: f32[4,1,8], index: 6, kind: input, shape index: {}]   ;;  %s1246_s7 = inlined_call_operand.vmem [shape: bf16[4,8,32], index: 7, kind: input, shape index: {}]   ;;  %s1247_s8 = inlined_call_operand.vmem [shape: f32[1,32], index: 8, kind: input, shape index: {}]   ;;  %s1248_s9 = inlined_call_operand.vmem [shape: f32[1,32], index: 9, kind: input, shape index: {}]   ;;  %s1249_s10 = inlined_call_operand.vmem [shape: f32[1,32], index: 10, kind: input, shape index: {}]   ;;  %s1250_s11 = inlined_call_operand.vmem [shape: bf16[2,8,32], index: 11, kind: output, shape index: {}]  }
   0x1   :  { %1254 = sst [smem:[#allocation8_spill]] %s1239_s0  ;;  %s1116_s19 = smov 0  }
   0x2   :  { %1255 = sst [smem:[#allocation9_spill]] %s1240_s1  ;;  %s1118_s20 = smov 0  }
   0x3   :  { %1256 = sst [smem:[#allocation10_spill]] %s1241_s2  ;;  %s1120_s21 = smov 0  }
   0x4   :  { %1257 = sst [smem:[#allocation11_spill]] %s1249_s10 }
   0x5 LB: > { %1258 = sst [smem:[#allocation3_spill]] %s1040_s19  ;;  %s30_s22 = sadd.s32 1, %s1040_s19  ;;  %s1048_s21 = sphi %s1120_s21, %s21_s21   ;;  %s1044_s20 = sphi %s1118_s20, %s1271_s20   ;;  %s1040_s19 = sphi %s1116_s19, %s1270_s19   ;;  %s1036_s18 = sphi %s1114_s18, %s1269_s18   ;;  %s1032_s17 = sphi %s1112_s17, %s1268_s17  }
   0x6   : > { %1259 = sst [smem:[#allocation4_spill]] %s1044_s20  ;;  %s33_s23 = sadd.s32 1, %s1044_s20 }
   0x7   : > { %1260 = sst [smem:[#allocation5_spill]] %s1048_s21  ;;  %p31_p0 = scmp.ge.s32.totalorder %s30_s22, 4 }
   0x8   : > { %p901_p1 = scmp.ge.s32.totalorder %s1048_s21, 1  ;;  %p411_p2 = scmp.lt.s32.totalorder %s1048_s21, 9 }
   0x9   : > { %s1273_s22 = smov (%p31_p0, %s30_s22), 0  ;;  %s1275_s23 = smov (!%p31_p0, %s33_s23), %s1044_s20 }
   0xa   : > { %1261 = sst [smem:[#allocation6_spill]] %s1273_s22  ;;  %p412_p3 = pnand %p901_p1, %p411_p2 }
   0xb   : > { %p35_p4 = scmp.ge.s32.totalorder %s1275_s23, 2  ;;  %p477_p5 = scmp.lt.s32.totalorder (!%p412_p3), %s1036_s18, 1 }
   0xc   : > { %415 = sbr.rel (%p412_p3) target bundleno = 1106 (0x452), region = 64  ;;  %p481_p6 = scmp.lt.s32.totalorder (!%p412_p3), %s1032_s17, 3 }
   0xd   : > { %s1277_s23 = smov (%p35_p4, %s1275_s23), 0  ;;  %s1263_s0 = sld [smem:[#allocation8_spill]] (!%p412_p3) }
   0xe   : > { %1262 = sst [smem:[#allocation7_spill]] %s1277_s23  ;;  %p911_p7 = scmp.ne.s32.totalorder (!%p412_p3), %s1032_s17, 0 }
   0xf   : > { %s1264_s1 = sld [smem:[#allocation9_spill]] (!%p412_p3) }
  0x10   : > { %s1265_s2 = sld [smem:[#allocation10_spill]] (!%p412_p3) }
  0x11   : > { %s1279_s18 = smov (!%p477_p5, %s1036_s18), 1 }
  0x12   : > { %s1146_s24 = scalar_select %p481_p6, %s1032_s17, 3 }
  0x13   : > { %s902_s25 = sshll.u32 %s1279_s18, 2 }
  0x14   : > { %s480_s28 = scalar_lea.vmem %s1263_s0, %s902_s25  ;;  %s945_s29 = sshll.u32 %s1146_s24, 4 }
  0x15   : > { %s485_s13 = scalar_lea.vmem %s1264_s1, %s945_s29  ;;  %s1161_s20 = scalar_lea.vmem %s1242_s3, %s945_s29 }
  0x16   : > { %s490_s16 = scalar_lea.vmem %s1265_s2, %s945_s29  ;;  %s498_s21 = scalar_lea.vmem %s1243_s4, %s1146_s24 }
  0x17   : > { %s501_s0 = scalar_lea.vmem %s1244_s5, %s1146_s24  ;;  %s504_s12 = scalar_lea.vmem %s1245_s6, %s1146_s24 }
  0x18   : > { %s909_s1 = sshll.u32 %s1146_s24, 2  ;;  %s1179_s2 = scalar_lea.vmem %s1250_s11, %s902_s25 }
  0x19   : > { %s1184_s29 = scalar_lea.vmem %s1246_s7, %s909_s1  ;;  %517 = sbr.rel (%p911_p7) target bundleno = 32 (0x20), region = 68 }
  0x1e   : > { %vm518_vm0 = vcmask 261120   ;;  %v1050_v0 = vmov 0.0  }
  0x1f   : > { %519 = vst.msk [vmem:[#allocation2] sm:$0xff] %vm518_vm0, %v1050_v0 }
  0x20 PF: > { %v949_v1 = vld [vmem:[%s485_s13 + $0x8] sm:$0xff]  ;;  %v948_v3 = vld [vmem:[%s485_s13] sm:$0xff]  ;;  %vm541_vm1 = vcmask 261120   ;;  %vm627_vm2 = vcmask 64512   ;;  %vm663_vm3 = vcmask 1043456   ;;  %p942_p8 = scmp.ne.s32.totalorder %s1032_s17, 3 }
  0x21   : > { %v951_v2 = vld [vmem:[%s490_s16 + $0x8] sm:$0xff]  ;;  %551 = vmatpush.bf16.msra.mxu0 %v949_v1  ;;  %v950_v4 = vld [vmem:[%s490_s16] sm:$0xff]  ;;  %s1266_s25 = sld [smem:[#allocation11_spill]] (!%p942_p8) }
  0x22   : > { %584 = vmatpush.bf16.msra.mxu1 %v951_v2  ;;  %v1187_v5 = vld [vmem:[%s480_s28] sm:$0xf]  ;;  %v953_v18 = vld [vmem:[%s1161_s20 + $0x8] sm:$0xff] }
  0x23   : > { %v996_v6 = vld [vmem:[%s498_s21] ss:$0 sm:$0xff]  ;;  %617 = vmatpush.bf16.msra.mxu2 %v953_v18 }
  0x24   : > { %v997_v7 = vld [vmem:[%s501_s0] ss:$0 sm:$0xff] }
  0x25   : > { %552 = vmatpush.bf16.msra.mxu0 %v948_v3  ;;  %v952_v19 = vld [vmem:[%s1161_s20] sm:$0xff] }
  0x26   : > { %585 = vmatpush.bf16.msra.mxu1 %v950_v4  ;;  %v998_v23 = vld [vmem:[%s504_s12] ss:$0 sm:$0xff] }
  0x27   : > { %618 = vmatpush.bf16.msra.mxu2 %v952_v19  ;;  %v682_v34 = vld [vmem:[%s1184_s29] sm:$0xf] }
  0x28   : > { %920 = vmatmul.msk.bf16.vlgmr.msra.gmra.mxu0 %vm541_vm1, %v1187_v5  ;;  %v687_v35 = vsel %vm663_vm3, %v682_v34, 0  ;;  %v680_v43 = vld [vmem:[#allocation2] sm:$0xff] }
  0x29   : > { %929 = vmatmul.msk.bf16.vlgmr.msra.gmra.mxu1 %vm541_vm1, %v1187_v5 }
  0x2a   : > { %938 = vmatmul.msk.bf16.vlgmr.msra.gmra.mxu2 %vm541_vm1, %v1187_v5  ;;  %696 = vmatpush.bf16.msrb.mxu1 %v687_v35 }
  0xa5   : > { %v554_v8 = vpop.f32.mrf.mxu0 }
  0xa6   : > { %v587_v9 = vpop.f32.mrf.mxu1  ;;  %v555_v10 = vadd.f32 %v996_v6, %v554_v8 }
  0xa7   : > { %v588_v11 = vadd.f32 %v997_v7, %v587_v9 }
  0xa8   : > { %v624_v13 = vmul.f32 0.35355338, %v555_v10 }
  0xa9   : > { %v626_v12 = vpack.c.bf16 %v588_v11, %v588_v11 }
  0xaa   : > { %v625_v17 = vpack.c.bf16 %v624_v13, %v624_v13 }
  0xab   : > { %v632_v14 = vsel %vm627_vm2, %v626_v12, 0 }
  0xac   : > { %641 = vmatpush.bf16.xpose.msra.mxu3 %v632_v14 }
  0xad   : > { %v556_v15 = vpop.f32.mrf.mxu0  ;;  %v620_v24 = vpop.f32.mrf.mxu2 }
  0xae   : > { %v589_v16 = vpop.f32.mrf.mxu1  ;;  %v621_v26 = vadd.f32 %v998_v23, %v620_v24 }
  0xb0   : > { %v659_v28 = vpack.c.bf16 %v621_v26, %v621_v26 }
  0xb2   : > { %v665_v30 = vsel %vm663_vm3, %v659_v28, 0 }
  0xb3   : > { %939 = vmatmul.msk.bf16.vlgmr.msra.gmra.mxu3 %vm627_vm2, %v625_v17  ;;  %674 = vmatpush.bf16.msrb.mxu0 %v665_v30 }
  0xb5   : > { %v622_v31 = vpop.f32.mrf.mxu2 }
 0x136   : > { %v643_v20 = vpop.f32.mrf.mxu3 }
 0x137   : > { %v647_v21 = vsel %vm627_vm2, %v643_v20, -inf }
 0x138   : > { %648 = vmax.xlane.f32.xlu0 %v647_v21 }
 0x13e   : > { %v645_v22 = vpop.f32.mrf.mxu3 }
 0x1ab   : > { %v649_v25 = vpop.xlane.xlu0 %648 }
 0x1ac   : > { %v650_v27 = vsub.f32 %v643_v20, %v649_v25 }
 0x1ae   : > { %v651_v29 = vmul.f32 1.442695, %v650_v27 }
 0x1b0   : > { %999 = vpow2.f32 %v651_v29 }
 0x1b6   : > { %v1000_v32 = vpop.eup %999 }
 0x1b7   : > { %v653_v33 = vsel %vm627_vm2, %v1000_v32, 0.0 }
 0x1b8   : > { %654 = vadd.xlane.f32.xlu0 %v653_v33 }
 0x22b   : > { %v655_v36 = vpop.xlane.xlu0 %654 }
 0x22c   : > { %1001 = vrcp.f32 %v655_v36 }
 0x232   : > { %v1002_v37 = vpop.eup %1001 }
 0x233   : > { %v657_v38 = vmul.f32 %v1002_v37, %v1000_v32 }
 0x235   : > { %v658_v39 = vpack.c.bf16 %v657_v38, %v657_v38 }
 0x237   : > { %940 = vmatmul.msk.bf16.vlgmr.msrb.gmra.mxu0 %vm627_vm2, %v658_v39 }
 0x2b4   : > { %v676_v40 = vpop.f32.mrf.mxu0 }
 0x2b5   : > { %v681_v41 = vpack.c.bf16 %v676_v40, %v676_v40 }
 0x2b7   : > { %941 = vmatmul.msk.bf16.vlgmr.msrb.gmra.mxu1 %vm627_vm2, %v681_v41 }
 0x2bc   : > { %v678_v42 = vpop.f32.mrf.mxu0 }
 0x334   : > { %v698_v44 = vpop.f32.mrf.mxu1 }
 0x335   : > { %v702_v45 = vadd.f32 %v698_v44, %v680_v43 }
 0x337   : > { %703 = vst.msk [vmem:[#allocation2] sm:$0xff] %vm541_vm1, %v702_v45 }
 0x338   : > { %707 = sbr.rel (%p942_p8) target bundleno = 1106 (0x452), region = 72 }
 0x33c   : > { %v700_v46 = vpop.f32.mrf.mxu1 }
 0x33d   : > { %v1003_v48 = vld [vmem:[%s1247_s8] ss:$0 sm:$0xff]  ;;  %v714_v49 = vunpack.c.l.bf16 %v1187_v5  ;;  %v1051_v53 = vmov 32.0   ;;  %vm756_vm8 = vcmask 257024  }
 0x33e   : > { %v708_v47 = vld [vmem:[#allocation2] sm:$0xff]  ;;  %1006 = vrcp.f32 %v1051_v53 }
 0x33f   : > { %v713_v50 = vadd.f32 %v1003_v48, %v708_v47  ;;  %v1004_v10 = vld [vmem:[%s1248_s9] ss:$0 sm:$0xff] }
 0x340   : > { %v1005_v12 = vld [vmem:[%s1266_s25] ss:$0 sm:$0xff] }
 0x341   : > { %v715_v51 = vadd.f32 %v714_v49, %v713_v50 }
 0x343   : > { %v716_v52 = vsel %vm541_vm1, %v715_v51, 0.0 }
 0x344   : > { %717 = vadd.xlane.f32.xlu0 %v716_v52  ;;  %v1007_v54 = vpop.eup %1006 }
 0x345   : > { %v720_v55 = vmul.f32 32.0, %v1007_v54  ;;  %vm724_vm4 = vweird.f32 %v1007_v54 }
 0x347   : > { %v721_v56 = vsub.f32 1.0, %v720_v55 }
 0x349   : > { %v722_v57 = vmul.f32 %v1007_v54, %v721_v56 }
 0x34b   : > { %v723_v58 = vadd.f32 %v1007_v54, %v722_v57 }
 0x34d   : > { %v725_v59 = vsel %vm724_vm4, %v1007_v54, %v723_v58 }
 0x3b7   : > { %v718_v60 = vpop.xlane.xlu0 %717 }
 0x3b8   : > { %v726_v61 = vmul.f32 %v725_v59, %v718_v60 }
 0x3ba   : > { %v727_v62 = vsub.f32 %v715_v51, %v726_v61 }
 0x3bc   : > { %v728_v63 = vmul.f32 %v727_v62, %v727_v62 }
 0x3be   : > { %v729_v0 = vsel %vm541_vm1, %v728_v63, 0.0 }
 0x3bf   : > { %730 = vadd.xlane.f32.xlu0 %v729_v0 }
 0x432   : > { %v731_v1 = vpop.xlane.xlu0 %730 }
 0x433   : > { %v732_v2 = vmul.f32 %v731_v1, %v725_v59 }
 0x435   : > { %v733_v3 = vadd.f32 1e-05, %v732_v2 }
 0x437   : > { %1008 = vrsqrt.f32 %v733_v3  ;;  %vm740_vm6 = vweird.f32 %v733_v3 }
 0x43d   : > { %v1009_v4 = vpop.eup %1008 }
 0x43e   : > { %v735_v5 = vmul.f32 %v1009_v4, %v733_v3  ;;  %vm741_vm5 = vweird.f32 %v1009_v4 }
 0x43f   : > { %vm742_vm7 = vmor %vm740_vm6, %vm741_vm5 }
 0x440   : > { %v736_v6 = vmul.f32 %v1009_v4, %v735_v5 }
 0x442   : > { %v737_v7 = vmul.f32 0.5, %v736_v6 }
 0x444   : > { %v738_v8 = vsub.f32 1.5, %v737_v7 }
 0x446   : > { %v739_v9 = vmul.f32 %v1009_v4, %v738_v8 }
 0x448   : > { %v743_v11 = vsel %vm742_vm7, %v1009_v4, %v739_v9 }
 0x449   : > { %v744_v13 = vmul.f32 %v743_v11, %v727_v62 }
 0x44b   : > { %v749_v14 = vmul.f32 %v1004_v10, %v744_v13 }
 0x44d   : > { %v754_v15 = vadd.f32 %v1005_v12, %v749_v14 }
 0x44f   : > { %v755_v16 = vpack.c.bf16 %v754_v15, %v754_v15 }
 0x451   : > { %757 = vst.msk [vmem:[%s1179_s2] sm:$0xf] %vm756_vm8, %v755_v16 }
 0x452 PF: > { %s1267_s28 = sld [smem:[#allocation5_spill]] }
 0x453   : > { %s1268_s17 = sld [smem:[#allocation3_spill]] }
 0x454   : > { %s1269_s18 = sld [smem:[#allocation4_spill]] }
 0x455   : > { %s1270_s19 = sld [smem:[#allocation6_spill]] }
 0x456   : > { %s1271_s20 = sld [smem:[#allocation7_spill]] }
 0x458   : > { %s21_s21 = sadd.s32 1, %s1267_s28  }
 0x459   : > { %p18_p9 = scmp.ge.s32.totalorder %s21_s21, 10  }
 0x45b   :  { %20 = sbr.rel (!%p18_p9) target bundleno = 5 (0x5), region = 123 }

// kernel: transformer_classifier_forward.13
= control target key start
LH: loop header
LB: loop body
LE: loop exit
PB: predicated region body
PF: predicated region fallthrough
CT: control target
= control target key end

     0   :  { %s398_s0 = inlined_call_operand.vmem [shape: bf16[2,256], index: 0, kind: input, shape index: {}]   ;;  %s399_s1 = inlined_call_operand.vmem [shape: bf16[256,128], index: 1, kind: input, shape index: {}]   ;;  %s400_s2 = inlined_call_operand.vmem [shape: f32[1,128], index: 2, kind: input, shape index: {}]   ;;  %s401_s3 = inlined_call_operand.hbm [shape: f32[2,128], index: 3, kind: output, shape index: {}]  }
   0x1   :  { %v281_v0 = vld [vmem:[%s399_s1 + $0x38] sm:$0xff]  ;;  %v280_v2 = vld [vmem:[%s399_s1 + $0x30] sm:$0xff]  ;;  %v21_v4 = vld [vmem:[%s398_s0] sm:$0x3] }
   0x2   :  { %v289_v1 = vld [vmem:[%s399_s1 + $0x78] sm:$0xff]  ;;  %156 = vmatpush.bf16.msra.mxu0 %v281_v0  ;;  %v288_v3 = vld [vmem:[%s399_s1 + $0x70] sm:$0xff] }
   0x3   :  { %169 = vmatpush.bf16.msra.mxu1 %v289_v1 }
   0x4   :  { %8 = vsyncpa [#allocation4], 0  ;;  %v279_v5 = vld [vmem:[%s399_s1 + $0x28] sm:$0xff]  ;;  %55 = vst [vmem:[#allocation1] ss:$9 sm:$0xff] %v21_v4  ;;  %v278_v7 = vld [vmem:[%s399_s1 + $0x20] sm:$0xff] }
   0x5   :  { %v287_v6 = vld [vmem:[%s399_s1 + $0x68] sm:$0xff]  ;;  %v286_v8 = vld [vmem:[%s399_s1 + $0x60] sm:$0xff]  ;;  %v277_v9 = vld [vmem:[%s399_s1 + $0x18] sm:$0xff]  ;;  %v319_v19 = vmov 0.0   ;;  %s201_s23 = sshll.u32 %s401_s3, 4  ;;  %s202_s23 = int_to_ptr.hbm [resolvable:$true] %s201_s23 }
   0x6   :  { %157 = vmatpush.bf16.msra.mxu0 %v280_v2  ;;  %v285_v10 = vld [vmem:[%s399_s1 + $0x58] sm:$0xff]  ;;  %v276_v11 = vld [vmem:[%s399_s1 + $0x10] sm:$0xff]  ;;  %v275_v13 = vld [vmem:[%s399_s1 + $0x8] sm:$0xff]  ;;  %19 = vst [vmem:[#allocation2] sm:$0x3] %v319_v19 }
   0x7   :  { %170 = vmatpush.bf16.msra.mxu1 %v288_v3  ;;  %v284_v12 = vld [vmem:[%s399_s1 + $0x50] sm:$0xff]  ;;  %v283_v14 = vld [vmem:[%s399_s1 + $0x48] sm:$0xff]  ;;  %v274_v15 = vld [vmem:[%s399_s1] sm:$0xff] }
   0x8   :  { %v282_v16 = vld [vmem:[%s399_s1 + $0x40] sm:$0xff]  ;;  %s320_s1 = smov [#allocation3]  }
   0x9   :  { %v292_v27 = vld [vmem:[%s400_s2] ss:$0 sm:$0xff]  ;;  %s199_s20 = sshll.u32 %s320_s1, 4  ;;  %s200_s20 = int_to_ptr.vmem [resolvable:$true] %s199_s20 }
   0xa   :  { %158 = vmatpush.bf16.msra.mxu0 %v279_v5 }
   0xb   :  { %171 = vmatpush.bf16.msra.mxu1 %v287_v6  ;;  %v56_v17 = vld [vmem:[#allocation1] sm:$0xff]  ;;  %v57_v18 = vld [vmem:[#allocation1 + $0x9] sm:$0xff] }
   0xd   :  { %v20_v21 = vld [vmem:[#allocation2] sm:$0x3] }
   0xe   :  { %159 = vmatpush.bf16.msra.mxu0 %v278_v7 }
   0xf   :  { %172 = vmatpush.bf16.msra.mxu1 %v286_v8 }
  0x12   :  { %160 = vmatpush.bf16.msra.mxu0 %v277_v9 }
  0x13   :  { %173 = vmatpush.bf16.msra.mxu1 %v285_v10 }
  0x16   :  { %161 = vmatpush.bf16.msra.mxu0 %v276_v11 }
  0x17   :  { %174 = vmatpush.bf16.msra.mxu1 %v284_v12 }
  0x1a   :  { %162 = vmatpush.bf16.msra.mxu0 %v275_v13 }
  0x1b   :  { %175 = vmatpush.bf16.msra.mxu1 %v283_v14 }
  0x1e   :  { %163 = vmatpush.bf16.msra.mxu0 %v274_v15 }
  0x1f   :  { %176 = vmatpush.bf16.msra.mxu1 %v282_v16 }
  0x21   :  { %164 = vmatmul.bf16.vlgmr.msra.gmra.mxu0 %v56_v17 }
  0x22   :  { %177 = vmatmul.bf16.vlgmr.msra.gmra.mxu1 %v57_v18 }
  0x9e   :  { %v165_v20 = vpop.f32.mrf.mxu0 }
  0x9f   :  { %v178_v22 = vpop.f32.mrf.mxu1 }
  0xa0   :  { %v179_v23 = vadd.f32 %v178_v22, %v165_v20 }
  0xa2   :  { %v182_v24 = vadd.f32 %v179_v23, %v20_v21 }
  0xa4   :  { %183 = vst [vmem:[#allocation2] sm:$0x3] %v182_v24 }
  0xa6   :  { %v167_v25 = vpop.f32.mrf.mxu0 }
  0xa7   :  { %v180_v26 = vpop.f32.mrf.mxu1 }
  0xab   :  { %v187_v28 = vld [vmem:[#allocation2] sm:$0x3] }
  0xac   :  { %v192_v29 = vadd.f32 %v292_v27, %v187_v28 }
  0xae   :  { %193 = vst [vmem:[#allocation3] sm:$0x3] %v192_v29 }
  0xaf   :  { %204 = dma.vmem_to_hbm [thread:$0]  %s200_s20, 32, %s202_s23, [#allocation4]  }
  0xb0   :  { %317 = dma.done.wait [#allocation4], 32  }
  0xb1   :  { %318 = vsyncadd [#allocation4], 4294967264 }
  0xb2   :  { %209 = vsyncpa [#allocation4], 1 }

// kernel: transformer_classifier_forward.12
= control target key start
LH: loop header
LB: loop body
LE: loop exit
PB: predicated region body
PF: predicated region fallthrough
CT: control target
= control target key end

     0   :  { %vm18_vm0 = vcmask 261120   ;;  %v104_v5 = vmov 32.0   ;;  %vm84_vm6 = vcmask 257024   ;;  %s144_s0 = inlined_call_operand.vmem [shape: bf16[16,32], index: 0, kind: input, shape index: {}]   ;;  %s145_s1 = inlined_call_operand.vmem [shape: f32[1,32], index: 1, kind: input, shape index: {}]   ;;  %s146_s2 = inlined_call_operand.vmem [shape: f32[1,32], index: 2, kind: input, shape index: {}]   ;;  %s147_s3 = inlined_call_operand.vmem [shape: bf16[16,32], index: 3, kind: output, shape index: {}]  }
   0x1   :  { %v92_v0 = vld [vmem:[%s144_s0] sm:$0xff]   ;;  %98 = vrcp.f32 %v104_v5 }
   0x2   :  { %v93_v1 = vunpack.c.l.bf16 %v92_v0  ;;  %v94_v3 = vunpack.c.h.bf16 %v92_v0  ;;  %v96_v36 = vld [vmem:[%s145_s1] ss:$0 sm:$0xff] }
   0x3   :  { %v97_v39 = vld [vmem:[%s146_s2] ss:$0 sm:$0xff] }
   0x4   :  { %v19_v2 = vsel %vm18_vm0, %v93_v1, 0.0  ;;  %v22_v4 = vsel %vm18_vm0, %v94_v3, 0.0 }
   0x5   :  { %20 = vadd.xlane.f32.xlu0 %v19_v2 }
   0x7   :  { %v99_v6 = vpop.eup %98 }
   0x8   :  { %v26_v7 = vmul.f32 32.0, %v99_v6  ;;  %vm30_vm1 = vweird.f32 %v99_v6 }
   0xa   :  { %v27_v8 = vsub.f32 1.0, %v26_v7 }
   0xc   :  { %v28_v9 = vmul.f32 %v99_v6, %v27_v8 }
   0xd   :  { %23 = vadd.xlane.f32.xlu0 %v22_v4 }
   0xe   :  { %v29_v10 = vadd.f32 %v99_v6, %v28_v9 }
  0x10   :  { %v31_v11 = vsel %vm30_vm1, %v99_v6, %v29_v10 }
  0x78   :  { %v21_v12 = vpop.xlane.xlu0 %20 }
  0x79   :  { %v32_v13 = vmul.f32 %v31_v11, %v21_v12 }
  0x7b   :  { %v34_v14 = vsub.f32 %v93_v1, %v32_v13 }
  0x7d   :  { %v36_v15 = vmul.f32 %v34_v14, %v34_v14 }
  0x7f   :  { %v38_v16 = vsel %vm18_vm0, %v36_v15, 0.0 }
  0x80   :  { %39 = vadd.xlane.f32.xlu1 %v38_v16  ;;  %v24_v17 = vpop.xlane.xlu0 %23 }
  0x81   :  { %v33_v18 = vmul.f32 %v31_v11, %v24_v17 }
  0x83   :  { %v35_v19 = vsub.f32 %v94_v3, %v33_v18 }
  0x85   :  { %v37_v20 = vmul.f32 %v35_v19, %v35_v19 }
  0x87   :  { %v41_v21 = vsel %vm18_vm0, %v37_v20, 0.0 }
  0x88   :  { %42 = vadd.xlane.f32.xlu1 %v41_v21 }
  0xf3   :  { %v40_v22 = vpop.xlane.xlu1 %39 }
  0xf4   :  { %v44_v23 = vmul.f32 %v40_v22, %v31_v11 }
  0xf6   :  { %v46_v24 = vadd.f32 1e-05, %v44_v23 }
  0xf8   :  { %100 = vrsqrt.f32 %v46_v24  ;;  %vm54_vm3 = vweird.f32 %v46_v24 }
  0xfb   :  { %v43_v25 = vpop.xlane.xlu1 %42 }
  0xfc   :  { %v45_v26 = vmul.f32 %v43_v25, %v31_v11 }
  0xfe   :  { %v101_v27 = vpop.eup %100  ;;  %v47_v28 = vadd.f32 1e-05, %v45_v26 }
  0xff   :  { %v49_v29 = vmul.f32 %v101_v27, %v46_v24  ;;  %vm55_vm2 = vweird.f32 %v101_v27 }
 0x100   :  { %102 = vrsqrt.f32 %v47_v28  ;;  %vm56_vm4 = vmor %vm54_vm3, %vm55_vm2  ;;  %vm64_vm7 = vweird.f32 %v47_v28 }
 0x101   :  { %v50_v30 = vmul.f32 %v101_v27, %v49_v29 }
 0x103   :  { %v51_v31 = vmul.f32 0.5, %v50_v30 }
 0x105   :  { %v52_v32 = vsub.f32 1.5, %v51_v31 }
 0x106   :  { %v103_v33 = vpop.eup %102 }
 0x107   :  { %v53_v34 = vmul.f32 %v101_v27, %v52_v32  ;;  %v59_v35 = vmul.f32 %v103_v33, %v47_v28  ;;  %vm65_vm5 = vweird.f32 %v103_v33 }
 0x108   :  { %vm66_vm8 = vmor %vm64_vm7, %vm65_vm5 }
 0x109   :  { %v57_v37 = vsel %vm56_vm4, %v101_v27, %v53_v34  ;;  %v60_v38 = vmul.f32 %v103_v33, %v59_v35 }
 0x10a   :  { %v68_v40 = vmul.f32 %v57_v37, %v34_v14 }
 0x10b   :  { %v61_v41 = vmul.f32 0.5, %v60_v38 }
 0x10c   :  { %v74_v42 = vmul.f32 %v96_v36, %v68_v40 }
 0x10d   :  { %v62_v43 = vsub.f32 1.5, %v61_v41 }
 0x10e   :  { %v80_v44 = vadd.f32 %v97_v39, %v74_v42 }
 0x10f   :  { %v63_v45 = vmul.f32 %v103_v33, %v62_v43 }
 0x110   :  { %v82_v46 = vpack.c.bf16 %v80_v44, %v80_v44 }
 0x111   :  { %v67_v47 = vsel %vm66_vm8, %v103_v33, %v63_v45 }
 0x112   :  { %85 = vst.msk [vmem:[%s147_s3] sm:$0xf] %vm84_vm6, %v82_v46  ;;  %v69_v48 = vmul.f32 %v67_v47, %v35_v19 }
 0x114   :  { %v75_v49 = vmul.f32 %v96_v36, %v69_v48 }
 0x116   :  { %v81_v50 = vadd.f32 %v97_v39, %v75_v49 }
 0x118   :  { %v83_v51 = vpack.c.bf16 %v81_v50, %v81_v50 }
 0x11a   :  { %86 = vst.msk [vmem:[%s147_s3 + $0x4] sm:$0xf] %vm84_vm6, %v83_v51 }

</bundles_post_ra>
